<compile_context>
chip_gen: v5e
topology: v5e:2x2
jax: 0.10.0
libtpu: 0.0.40
codegen_flags: <defaults>
</compile_context>

<pallas_src>
import functools

import jax
import jax.numpy as jnp
from jax.experimental import pallas as pl
from jax.experimental.pallas import tpu as pltpu

EPS = 1e-5


def fused_kernel(x335_ref, x329_ref, gamma_ref, beta_ref, w1_ref, w2_ref, out_ref):
    """One grid step = one channel tile k of the intermediate x342 / x345.

    Per step:
      x342[:, kT] = x335 @ w1s[:, kT]        (conv2d108; x340 scale folded into w1s)
      training BN over the P rows -> + x329[:, kT] -> ReLU -> x345_k   (cast to bf16)
      out[:, :]  += x345_k @ w2t[kT, :]      (conv2d109, accumulated over k)
    """
    k = pl.program_id(0)

    # conv2d108 output channels for this tile: bf16 MXU matmul, f32 accumulation.
    x342 = jnp.dot(x335_ref[...], w1_ref[...], preferred_element_type=jnp.float32)

    # Training-mode BatchNorm2d: per-channel stats over the P = N*H*W rows.
    # Two-pass mean/var (better cancellation than E[x^2] - E[x]^2), all in f32.
    p = x342.shape[0]
    mean = jnp.sum(x342, axis=0, keepdims=True) * (1.0 / p)
    d = x342 - mean
    var = jnp.sum(d * d, axis=0, keepdims=True) * (1.0 / p)
    x343 = d * (jax.lax.rsqrt(var + EPS) * gamma_ref[...]) + beta_ref[...]

    # Residual add + ReLU in f32; bf16 is enough downstream (MXU operand only).
    x345 = jnp.maximum(x329_ref[...] + x343, 0.0).astype(jnp.bfloat16)

    # conv2d109: accumulate this tile's contribution into the resident output block.
    @pl.when(k == 0)
    def _init():
        out_ref[...] = jnp.zeros_like(out_ref)

    out_ref[...] += jnp.dot(x345, w2_ref[...], preferred_element_type=jnp.float32)


def _round_up(x, m):
    return (x + m - 1) // m * m


@functools.partial(jax.jit, static_argnames=("tile",))
def model_forward(x340, x335, x329, w1_oihw, gamma, beta, w2_oihw, tile=None):
    """x340: (1,C,1,1); x335, x329: (N,C,H,W); w*_oihw: (C,C,1,1); gamma/beta: (C,)."""
    N, C, H, W = x335.shape
    P = N * H * W

    # Lane-dense channel tile (multiple of 128).  With bf16 weights, tile=1024 fits the
    # VMEM budget on v5e/v6e/v7x alike (see header); pad C up to a multiple of it so
    # every block is unmasked (e.g. C=2904 -> 3072).
    if tile is None:
        tile = min(1024, _round_up(C, 128))
    assert tile % 128 == 0
    Cp = _round_up(C, tile)
    n_blk = Cp // tile
    pad = Cp - C

    # NCHW -> (P, C) channels-last.  x335 is only an MXU operand -> bf16 (halves its
    # HBM + VMEM footprint); x329 stays f32 for the residual add.
    x335_f = jnp.transpose(x335, (0, 2, 3, 1)).reshape(P, C).astype(jnp.bfloat16)
    x329_f = jnp.transpose(x329, (0, 2, 3, 1)).reshape(P, C)
    scale = x340.reshape(1, C)
    g = gamma.reshape(1, C)
    b = beta.reshape(1, C)

    # Weight prep (single fused XLA op each): fold scale into w1 columns, transpose
    # (O,I) -> (I,O) so both in-kernel dots contract (1,)x(0,), and cast to bf16.
    w1 = w1_oihw.reshape(C, C)                       # (O, I)
    w2 = w2_oihw.reshape(C, C)                       # (O, I)
    w1_t = jnp.transpose(w1 * scale).astype(jnp.bfloat16)   # (I, O), scale folded
    w2_t = jnp.transpose(w2).astype(jnp.bfloat16)            # (I, O)

    if pad:
        # Zero padding is exactly neutral: padded weight rows/cols are zero, padded
        # gamma/beta are zero, so padded x342/x343/x345 channels are zero and the
        # padded output columns (sliced off below) stay zero.
        x335_f = jnp.pad(x335_f, ((0, 0), (0, pad)))
        x329_f = jnp.pad(x329_f, ((0, 0), (0, pad)))
        g = jnp.pad(g, ((0, 0), (0, pad)))
        b = jnp.pad(b, ((0, 0), (0, pad)))
        w1_t = jnp.pad(w1_t, ((0, pad), (0, pad)))
        w2_t = jnp.pad(w2_t, ((0, pad), (0, pad)))

    out_flat = pl.pallas_call(
        fused_kernel,
        out_shape=jax.ShapeDtypeStruct((P, Cp), jnp.float32),
        grid_spec=pltpu.PrefetchScalarGridSpec(
            num_scalar_prefetch=0,
            grid=(n_blk,),
            in_specs=[
                # TODO(synk): pipeline_mode=pl.Buffered(1) on the two constant-index
                # blocks (x335, out) would reclaim ~3.6 MiB on v7x; skipped for safety.
                pl.BlockSpec((P, Cp), lambda k: (0, 0)),      # x335 (bf16, resident)
                pl.BlockSpec((P, tile), lambda k: (0, k)),    # x329 tile (f32)
                pl.BlockSpec((1, tile), lambda k: (0, k)),    # gamma tile
                pl.BlockSpec((1, tile), lambda k: (0, k)),    # beta tile
                pl.BlockSpec((Cp, tile), lambda k: (0, k)),   # w1s^T (I, O) col block
                pl.BlockSpec((tile, Cp), lambda k: (k, 0)),   # w2^T  (I, O) row block
            ],
            out_specs=pl.BlockSpec((P, Cp), lambda k: (0, 0)),  # resident accumulator
        ),
        compiler_params=pltpu.CompilerParams(
            # Single accumulation axis -> must stay "arbitrary".
            dimension_semantics=("arbitrary",),
            # ~33 MiB working set at the real shape (tile=1024, bf16 weights); 48 MiB
            # keeps headroom under v7x's 64 MiB physical VMEM and is trivial on v5e/v6e.
            vmem_limit_bytes=48 << 20,
        ),
    )(x335_f, x329_f, g, b, w1_t, w2_t)

    out_flat = out_flat[:, :C]
    return jnp.transpose(out_flat.reshape(N, H, W, C), (0, 3, 1, 2))


def reference_forward(x340, x335, x329, w1_oihw, gamma, beta, w2_oihw):
    """Pure-JAX reference mirroring the PyTorch module (training-mode BN)."""
    dn = ("NCHW", "OIHW", "NCHW")
    x341 = x340 * x335
    x342 = jax.lax.conv_general_dilated(x341, w1_oihw, (1, 1), "VALID",
                                        dimension_numbers=dn)
    mean = jnp.mean(x342, axis=(0, 2, 3), keepdims=True)
    var = jnp.mean((x342 - mean) ** 2, axis=(0, 2, 3), keepdims=True)
    x343 = (x342 - mean) * jax.lax.rsqrt(var + EPS)
    x343 = x343 * gamma.reshape(1, -1, 1, 1) + beta.reshape(1, -1, 1, 1)
    x345 = jnp.maximum(x329 + x343, 0.0)
    x346 = jax.lax.conv_general_dilated(x345, w2_oihw, (1, 1), "VALID",
                                        dimension_numbers=dn)
    return x346


if __name__ == "__main__":
    # Small shapes consistent with the module (original RegNet shape: N=1, C=2904, H=W=14).
    configs = [
        (1, 512, 8, 8, 128),   # 4-step grid: exercises streaming / accumulation
        (1, 200, 4, 4, 128),   # exercises channel padding (200 -> 256)
    ]
    for (N, C, H, W, tile) in configs:
        key = jax.random.PRNGKey(0)
        k1, k2, k3, k4, k5, k6, k7 = jax.random.split(key, 7)

        x340 = jax.random.normal(k1, (1, C, 1, 1), dtype=jnp.float32)
        x335 = jax.random.normal(k2, (N, C, H, W), dtype=jnp.float32)
        x329 = jax.random.normal(k3, (N, C, H, W), dtype=jnp.float32)

        w1 = jax.random.normal(k4, (C, C, 1, 1), dtype=jnp.float32) * (1.0 / float(C) ** 0.5)
        w2 = jax.random.normal(k5, (C, C, 1, 1), dtype=jnp.float32) * (1.0 / float(C) ** 0.5)
        gamma = 1.0 + 0.1 * jax.random.normal(k6, (C,), dtype=jnp.float32)
        beta = 0.1 * jax.random.normal(k7, (C,), dtype=jnp.float32)

        out = jax.block_until_ready(
            model_forward(x340, x335, x329, w1, gamma, beta, w2, tile=tile))
        ref = jax.block_until_ready(
            reference_forward(x340, x335, x329, w1, gamma, beta, w2))

        assert out.shape == (N, C, H, W), out.shape
        max_err = float(jnp.max(jnp.abs(out - ref)))
        assert jnp.allclose(out, ref, rtol=2e-2, atol=2e-2), max_err

    print("KERNEL_OK")
</pallas_src>

<mosaic_0001>
module attributes {stable_mosaic.version = 11 : i64} {
  func.func @fused_kernel(%arg0: i32, %arg1: memref<64x512xbf16, #tpu.memory_space<vmem>>, %arg2: memref<64x128xf32, #tpu.memory_space<vmem>>, %arg3: memref<1x128xf32, #tpu.memory_space<vmem>>, %arg4: memref<1x128xf32, #tpu.memory_space<vmem>>, %arg5: memref<512x128xbf16, #tpu.memory_space<vmem>>, %arg6: memref<128x512xbf16, #tpu.memory_space<vmem>>, %arg7: memref<64x512xf32, #tpu.memory_space<vmem>>) attributes {dimension_semantics = [#tpu.dimension_semantics<arbitrary>], iteration_bounds = array<i64: 4>, scalar_prefetch = 0 : i64, scratch_operands = 0 : i64, tpu.core_type = #tpu.core_type<tc>, window_params = [{pipeline_mode = #tpu.pipeline_mode<synchronous>, transform_indices = @transform_0, window_bounds = array<i64: 64, 512>}, {transform_indices = @transform_1, window_bounds = array<i64: 64, 128>}, {transform_indices = @transform_2, window_bounds = array<i64: 1, 128>}, {transform_indices = @transform_3, window_bounds = array<i64: 1, 128>}, {transform_indices = @transform_4, window_bounds = array<i64: 512, 128>}, {transform_indices = @transform_5, window_bounds = array<i64: 128, 512>}, {pipeline_mode = #tpu.pipeline_mode<synchronous>, transform_indices = @transform_6, window_bounds = array<i64: 64, 512>}]} {
    %c0 = arith.constant 0 : index
    %c0_0 = arith.constant 0 : index
    %0 = vector.load %arg1[%c0, %c0_0] : memref<64x512xbf16, #tpu.memory_space<vmem>>, vector<64x512xbf16>
    %c0_1 = arith.constant 0 : index
    %c0_2 = arith.constant 0 : index
    %1 = vector.load %arg5[%c0_1, %c0_2] : memref<512x128xbf16, #tpu.memory_space<vmem>>, vector<512x128xbf16>
    %cst = arith.constant dense<0.000000e+00> : vector<64x128xf32>
    %2 = tpu.matmul %0, %1, %cst {dimension_numbers = #tpu.dot_dimension_numbers<[1], [0], [0], [1], [0, 0, 1, 1], [], []>} : vector<64x512xbf16>, vector<512x128xbf16>, vector<64x128xf32> -> vector<64x128xf32>
    %cst_3 = arith.constant dense<0.000000e+00> : vector<128xf32>
    %3 = vector.multi_reduction <add>, %2, %cst_3 [0] : vector<64x128xf32> to vector<128xf32>
    %4 = vector.shape_cast %3 : vector<128xf32> to vector<1x128xf32>
    %cst_4 = arith.constant 1.562500e-02 : f32
    %5 = vector.broadcast %cst_4 : f32 to vector<1x128xf32>
    %6 = arith.mulf %4, %5 : vector<1x128xf32>
    %7 = vector.broadcast %6 : vector<1x128xf32> to vector<64x128xf32>
    %8 = arith.subf %2, %7 : vector<64x128xf32>
    %9 = arith.mulf %8, %8 : vector<64x128xf32>
    %cst_5 = arith.constant dense<0.000000e+00> : vector<128xf32>
    %10 = vector.multi_reduction <add>, %9, %cst_5 [0] : vector<64x128xf32> to vector<128xf32>
    %11 = vector.shape_cast %10 : vector<128xf32> to vector<1x128xf32>
    %cst_6 = arith.constant 1.562500e-02 : f32
    %12 = vector.broadcast %cst_6 : f32 to vector<1x128xf32>
    %13 = arith.mulf %11, %12 : vector<1x128xf32>
    %cst_7 = arith.constant 9.99999974E-6 : f32
    %14 = vector.broadcast %cst_7 : f32 to vector<1x128xf32>
    %15 = arith.addf %13, %14 : vector<1x128xf32>
    %16 = math.rsqrt %15 : vector<1x128xf32>
    %c0_8 = arith.constant 0 : index
    %c0_9 = arith.constant 0 : index
    %17 = vector.load %arg3[%c0_8, %c0_9] : memref<1x128xf32, #tpu.memory_space<vmem>>, vector<1x128xf32>
    %18 = arith.mulf %16, %17 : vector<1x128xf32>
    %19 = vector.broadcast %18 : vector<1x128xf32> to vector<64x128xf32>
    %20 = arith.mulf %8, %19 : vector<64x128xf32>
    %c0_10 = arith.constant 0 : index
    %c0_11 = arith.constant 0 : index
    %21 = vector.load %arg4[%c0_10, %c0_11] : memref<1x128xf32, #tpu.memory_space<vmem>>, vector<1x128xf32>
    %22 = vector.broadcast %21 : vector<1x128xf32> to vector<64x128xf32>
    %23 = arith.addf %20, %22 : vector<64x128xf32>
    %c0_12 = arith.constant 0 : index
    %c0_13 = arith.constant 0 : index
    %24 = vector.load %arg2[%c0_12, %c0_13] : memref<64x128xf32, #tpu.memory_space<vmem>>, vector<64x128xf32>
    %25 = arith.addf %24, %23 : vector<64x128xf32>
    %cst_14 = arith.constant 0.000000e+00 : f32
    %26 = vector.broadcast %cst_14 : f32 to vector<64x128xf32>
    %27 = arith.maximumf %25, %26 : vector<64x128xf32>
    %28 = arith.truncf %27 : vector<64x128xf32> to vector<64x128xbf16>
    %c0_i32 = arith.constant 0 : i32
    %29 = arith.cmpi eq, %arg0, %c0_i32 : i32
    %30 = arith.extui %29 : i1 to i32
    %c0_i32_15 = arith.constant 0 : i32
    %31 = arith.cmpi ne, %30, %c0_i32_15 : i32
    scf.if %31 {
      %cst_23 = arith.constant 0.000000e+00 : f32
      %37 = vector.broadcast %cst_23 : f32 to vector<64x512xf32>
      %c0_24 = arith.constant 0 : index
      %c0_25 = arith.constant 0 : index
      %38 = vector.load %arg7[%c0_24, %c0_25] : memref<64x512xf32, #tpu.memory_space<vmem>>, vector<64x512xf32>
      tpu.vector_store %arg7[%c0_24, %c0_25], %37 {strides = array<i32>} : memref<64x512xf32, #tpu.memory_space<vmem>>, vector<64x512xf32>,
    } else {
    }
    %c0_16 = arith.constant 0 : index
    %c0_17 = arith.constant 0 : index
    %32 = vector.load %arg7[%c0_16, %c0_17] : memref<64x512xf32, #tpu.memory_space<vmem>>, vector<64x512xf32>
    %c0_18 = arith.constant 0 : index
    %c0_19 = arith.constant 0 : index
    %33 = vector.load %arg6[%c0_18, %c0_19] : memref<128x512xbf16, #tpu.memory_space<vmem>>, vector<128x512xbf16>
    %cst_20 = arith.constant dense<0.000000e+00> : vector<64x512xf32>
    %34 = tpu.matmul %28, %33, %cst_20 {dimension_numbers = #tpu.dot_dimension_numbers<[1], [0], [0], [1], [0, 0, 1, 1], [], []>} : vector<64x128xbf16>, vector<128x512xbf16>, vector<64x512xf32> -> vector<64x512xf32>
    %35 = arith.addf %32, %34 : vector<64x512xf32>
    %c0_21 = arith.constant 0 : index
    %c0_22 = arith.constant 0 : index
    %36 = vector.load %arg7[%c0_21, %c0_22] : memref<64x512xf32, #tpu.memory_space<vmem>>, vector<64x512xf32>
    tpu.vector_store %arg7[%c0_21, %c0_22], %35 {strides = array<i32>} : memref<64x512xf32, #tpu.memory_space<vmem>>, vector<64x512xf32>,
    return
  }
  func.func @transform_0(%arg0: i32) -> (i32, i32) {
    %c0_i32 = arith.constant 0 : i32
    %c0_i32_0 = arith.constant 0 : i32
    %c0_i32_1 = arith.constant 0 : i32
    return %c0_i32, %c0_i32_0 : i32, i32
  }
  func.func @transform_1(%arg0: i32) -> (i32, i32) {
    %c0_i32 = arith.constant 0 : i32
    %c0_i32_0 = arith.constant 0 : i32
    return %c0_i32, %arg0 : i32, i32
  }
  func.func @transform_2(%arg0: i32) -> (i32, i32) {
    %c0_i32 = arith.constant 0 : i32
    %c0_i32_0 = arith.constant 0 : i32
    return %c0_i32, %arg0 : i32, i32
  }
  func.func @transform_3(%arg0: i32) -> (i32, i32) {
    %c0_i32 = arith.constant 0 : i32
    %c0_i32_0 = arith.constant 0 : i32
    return %c0_i32, %arg0 : i32, i32
  }
  func.func @transform_4(%arg0: i32) -> (i32, i32) {
    %c0_i32 = arith.constant 0 : i32
    %c0_i32_0 = arith.constant 0 : i32
    return %c0_i32, %arg0 : i32, i32
  }
  func.func @transform_5(%arg0: i32) -> (i32, i32) {
    %c0_i32 = arith.constant 0 : i32
    %c0_i32_0 = arith.constant 0 : i32
    return %arg0, %c0_i32 : i32, i32
  }
  func.func @transform_6(%arg0: i32) -> (i32, i32) {
    %c0_i32 = arith.constant 0 : i32
    %c0_i32_0 = arith.constant 0 : i32
    %c0_i32_1 = arith.constant 0 : i32
    return %c0_i32, %c0_i32_0 : i32, i32
  }
}

</mosaic_0001>

<bundles_post_ra>
// kernel: model_forward.1
= control target key start
LH: loop header
LB: loop body
LE: loop exit
PB: predicated region body
PF: predicated region fallthrough
CT: control target
= control target key end

     0   :  { %11 = vsyncpa [#allocation5], 0  ;;  %s2338_s21 = smov 0   ;;  %s2340_s22 = smov 0   ;;  %s2782_s0 = inlined_call_operand.vmem [shape: bf16[64,512], index: 0, kind: input, shape index: {}]   ;;  %s2783_s1 = inlined_call_operand.vmem [shape: f32[64,512], index: 1, kind: input, shape index: {}]   ;;  %s2784_s2 = inlined_call_operand.vmem [shape: f32[1,512], index: 2, kind: input, shape index: {}]   ;;  %s2785_s3 = inlined_call_operand.vmem [shape: f32[1,512], index: 3, kind: input, shape index: {}]   ;;  %s2786_s4 = inlined_call_operand.vmem [shape: bf16[512,512], index: 4, kind: input, shape index: {}]   ;;  %s2787_s5 = inlined_call_operand.vmem [shape: bf16[512,512], index: 5, kind: input, shape index: {}]   ;;  %s2788_s6 = inlined_call_operand.hbm [shape: f32[64,512], index: 6, kind: output, shape index: {}]  }
   0x1   :  { %s2342_s23 = smov 0  }
   0x2 LB: > { %s2354_s24 = sadd.s32 4294967295, %s2297_s23   ;;  %s2357_s25 = sadd.s32 1, %s2297_s23   ;;  %s2297_s23 = sphi %s2342_s23, %s2792_s23   ;;  %s2293_s22 = sphi %s2340_s22, %s2791_s22   ;;  %s2289_s21 = sphi %s2338_s21, %s2790_s21  }
   0x3   : > { %s42_s26 = ssub.s32 %s2297_s23, %s2357_s25  ;;  %s45_s27 = sadd.s32 1, %s2293_s22 }
   0x4   : > { %p43_p0 = scmp.eq.s32.totalorder %s42_s26, 0  ;;  %p52_p1 = scmp.ne.s32.totalorder %s2293_s22, %s2289_s21 }
   0x5   : > { %p53_p2 = scmp.eq.s32.totalorder %s2297_s23, 0  ;;  %p1789_p4 = scmp.ge.s32.totalorder %s2297_s23, 4 }
   0x6   : > { %s2366_s28 = scalar_select %p43_p0, %s2293_s22, %s45_s27  }
   0x7   : > { %p2368_p3 = por %p53_p2, %p52_p1  ;;  %206 = sbr.rel (%p1789_p4) target bundleno = 92 (0x5c), region = 20 }
   0xc   : > { %209 = sbr.rel (!%p2368_p3) target bundleno = 24 (0x18), region = 24  ;;  %s211_s30 = sand.u32 (%p2368_p3), 1, %s2293_s22  }
   0xd   : > { %s1791_s7 = sshll.u32 (%p2368_p3), %s2297_s23, 3  ;;  %s1790_s8 = sshll.u32 (%p2368_p3), %s211_s30, 6 }
   0xe   : > { %s215_s11 = scalar_lea.vmem (%p2368_p3), %s2783_s1, %s1791_s7  ;;  %s213_s12 = scalar_lea.vmem (%p2368_p3), [#allocation2], %s1790_s8 }
   0xf   : > { %v258_v0 = vld [vmem:[%s215_s11] sm:$0xff] (%p2368_p3) }
  0x10   : > { %v260_v1 = vld [vmem:[%s215_s11 + $0x20] sm:$0xff] (%p2368_p3)  ;;  %259 = vst [vmem:[%s213_s12] sm:$0xff] (%p2368_p3), %v258_v0 }
  0x11   : > { %v262_v2 = vld [vmem:[%s215_s11 + $0x40] sm:$0xff]  ;;  %261 = vst [vmem:[%s213_s12 + $0x8] sm:$0xff] %v260_v1 }
  0x12   : > { %v264_v3 = vld [vmem:[%s215_s11 + $0x60] sm:$0xff]  ;;  %263 = vst [vmem:[%s213_s12 + $0x10] sm:$0xff] %v262_v2 }
  0x13   : > { %v266_v4 = vld [vmem:[%s215_s11 + $0x80] sm:$0xff]  ;;  %265 = vst [vmem:[%s213_s12 + $0x18] sm:$0xff] %v264_v3 }
  0x14   : > { %v268_v5 = vld [vmem:[%s215_s11 + $0xa0] sm:$0xff]  ;;  %267 = vst [vmem:[%s213_s12 + $0x20] sm:$0xff] %v266_v4 }
  0x15   : > { %v270_v6 = vld [vmem:[%s215_s11 + $0xc0] sm:$0xff]  ;;  %269 = vst [vmem:[%s213_s12 + $0x28] sm:$0xff] %v268_v5 }
  0x16   : > { %v272_v7 = vld [vmem:[%s215_s11 + $0xe0] sm:$0xff]  ;;  %271 = vst [vmem:[%s213_s12 + $0x30] sm:$0xff] %v270_v6 }
  0x17   : > { %273 = vst [vmem:[%s213_s12 + $0x38] sm:$0xff] %v272_v7 }
  0x18 PF: > { %291 = sbr.rel (!%p2368_p3) target bundleno = 92 (0x5c), region = 70  ;;  %s293_s13 = sand.u32 (%p2368_p3), 1, %s2293_s22  }
  0x19   : > { %s1793_s14 = sshll.u32 (%p2368_p3), %s2297_s23, 2  ;;  %s1792_s15 = sshll.u32 (%p2368_p3), %s293_s13, 8 }
  0x1a   : > { %s2387_s18 = scalar_lea.vmem (%p2368_p3), %s2786_s4, %s1793_s14  ;;  %s2391_s19 = scalar_lea.vmem (%p2368_p3), [#allocation3], %s1792_s15 }
  0x1b   : > { %v314_v8 = vld [vmem:[%s2387_s18] sm:$0xf] (%p2368_p3)  ;;  %v316_v9 = vld [vmem:[%s2387_s18 + $0x10] sm:$0xf] (%p2368_p3) }
  0x1c   : > { %315 = vst [vmem:[%s2391_s19] sm:$0xf] (%p2368_p3), %v314_v8  ;;  %v318_v10 = vld [vmem:[%s2387_s18 + $0x20] sm:$0xf] (%p2368_p3)  ;;  %v320_v11 = vld [vmem:[%s2387_s18 + $0x30] sm:$0xf] (%p2368_p3) }
  0x1d   : > { %317 = vst [vmem:[%s2391_s19 + $0x4] sm:$0xf] %v316_v9  ;;  %v322_v12 = vld [vmem:[%s2387_s18 + $0x40] sm:$0xf]  ;;  %v324_v13 = vld [vmem:[%s2387_s18 + $0x50] sm:$0xf] }
  0x1e   : > { %319 = vst [vmem:[%s2391_s19 + $0x8] sm:$0xf] %v318_v10  ;;  %v326_v14 = vld [vmem:[%s2387_s18 + $0x60] sm:$0xf]  ;;  %v328_v15 = vld [vmem:[%s2387_s18 + $0x70] sm:$0xf] }
  0x1f   : > { %321 = vst [vmem:[%s2391_s19 + $0xc] sm:$0xf] %v320_v11  ;;  %v330_v16 = vld [vmem:[%s2387_s18 + $0x80] sm:$0xf]  ;;  %v332_v17 = vld [vmem:[%s2387_s18 + $0x90] sm:$0xf] }
  0x20   : > { %323 = vst [vmem:[%s2391_s19 + $0x10] sm:$0xf] %v322_v12  ;;  %v334_v18 = vld [vmem:[%s2387_s18 + $0xa0] sm:$0xf]  ;;  %v336_v19 = vld [vmem:[%s2387_s18 + $0xb0] sm:$0xf] }
  0x21   : > { %325 = vst [vmem:[%s2391_s19 + $0x14] sm:$0xf] %v324_v13  ;;  %v338_v20 = vld [vmem:[%s2387_s18 + $0xc0] sm:$0xf]  ;;  %v340_v21 = vld [vmem:[%s2387_s18 + $0xd0] sm:$0xf] }
  0x22   : > { %327 = vst [vmem:[%s2391_s19 + $0x18] sm:$0xf] %v326_v14  ;;  %v342_v22 = vld [vmem:[%s2387_s18 + $0xe0] sm:$0xf]  ;;  %v344_v23 = vld [vmem:[%s2387_s18 + $0xf0] sm:$0xf] }
  0x23   : > { %329 = vst [vmem:[%s2391_s19 + $0x1c] sm:$0xf] %v328_v15  ;;  %v346_v24 = vld [vmem:[%s2387_s18 + $0x100] sm:$0xf]  ;;  %v348_v25 = vld [vmem:[%s2387_s18 + $0x110] sm:$0xf] }
  0x24   : > { %331 = vst [vmem:[%s2391_s19 + $0x20] sm:$0xf] %v330_v16  ;;  %v350_v26 = vld [vmem:[%s2387_s18 + $0x120] sm:$0xf]  ;;  %v352_v27 = vld [vmem:[%s2387_s18 + $0x130] sm:$0xf] }
  0x25   : > { %333 = vst [vmem:[%s2391_s19 + $0x24] sm:$0xf] %v332_v17  ;;  %v354_v28 = vld [vmem:[%s2387_s18 + $0x140] sm:$0xf]  ;;  %v356_v29 = vld [vmem:[%s2387_s18 + $0x150] sm:$0xf] }
  0x26   : > { %335 = vst [vmem:[%s2391_s19 + $0x28] sm:$0xf] %v334_v18  ;;  %v358_v30 = vld [vmem:[%s2387_s18 + $0x160] sm:$0xf]  ;;  %v360_v31 = vld [vmem:[%s2387_s18 + $0x170] sm:$0xf] }
  0x27   : > { %337 = vst [vmem:[%s2391_s19 + $0x2c] sm:$0xf] %v336_v19  ;;  %v362_v32 = vld [vmem:[%s2387_s18 + $0x180] sm:$0xf]  ;;  %v364_v33 = vld [vmem:[%s2387_s18 + $0x190] sm:$0xf] }
  0x28   : > { %339 = vst [vmem:[%s2391_s19 + $0x30] sm:$0xf] %v338_v20  ;;  %v366_v34 = vld [vmem:[%s2387_s18 + $0x1a0] sm:$0xf]  ;;  %v368_v35 = vld [vmem:[%s2387_s18 + $0x1b0] sm:$0xf] }
  0x29   : > { %341 = vst [vmem:[%s2391_s19 + $0x34] sm:$0xf] %v340_v21  ;;  %v370_v36 = vld [vmem:[%s2387_s18 + $0x1c0] sm:$0xf]  ;;  %v372_v37 = vld [vmem:[%s2387_s18 + $0x1d0] sm:$0xf] }
  0x2a   : > { %343 = vst [vmem:[%s2391_s19 + $0x38] sm:$0xf] %v342_v22  ;;  %v374_v38 = vld [vmem:[%s2387_s18 + $0x1e0] sm:$0xf]  ;;  %v376_v39 = vld [vmem:[%s2387_s18 + $0x1f0] sm:$0xf] }
  0x2b   : > { %345 = vst [vmem:[%s2391_s19 + $0x3c] sm:$0xf] %v344_v23  ;;  %v378_v40 = vld [vmem:[%s2387_s18 + $0x200] sm:$0xf]  ;;  %v380_v41 = vld [vmem:[%s2387_s18 + $0x210] sm:$0xf] }
  0x2c   : > { %347 = vst [vmem:[%s2391_s19 + $0x40] sm:$0xf] %v346_v24  ;;  %v382_v42 = vld [vmem:[%s2387_s18 + $0x220] sm:$0xf]  ;;  %v384_v43 = vld [vmem:[%s2387_s18 + $0x230] sm:$0xf] }
  0x2d   : > { %349 = vst [vmem:[%s2391_s19 + $0x44] sm:$0xf] %v348_v25  ;;  %v386_v44 = vld [vmem:[%s2387_s18 + $0x240] sm:$0xf]  ;;  %v388_v45 = vld [vmem:[%s2387_s18 + $0x250] sm:$0xf] }
  0x2e   : > { %351 = vst [vmem:[%s2391_s19 + $0x48] sm:$0xf] %v350_v26  ;;  %v390_v46 = vld [vmem:[%s2387_s18 + $0x260] sm:$0xf]  ;;  %v392_v47 = vld [vmem:[%s2387_s18 + $0x270] sm:$0xf] }
  0x2f   : > { %353 = vst [vmem:[%s2391_s19 + $0x4c] sm:$0xf] %v352_v27  ;;  %v394_v48 = vld [vmem:[%s2387_s18 + $0x280] sm:$0xf]  ;;  %v396_v49 = vld [vmem:[%s2387_s18 + $0x290] sm:$0xf] }
  0x30   : > { %355 = vst [vmem:[%s2391_s19 + $0x50] sm:$0xf] %v354_v28  ;;  %v398_v50 = vld [vmem:[%s2387_s18 + $0x2a0] sm:$0xf]  ;;  %v400_v51 = vld [vmem:[%s2387_s18 + $0x2b0] sm:$0xf] }
  0x31   : > { %357 = vst [vmem:[%s2391_s19 + $0x54] sm:$0xf] %v356_v29  ;;  %v402_v52 = vld [vmem:[%s2387_s18 + $0x2c0] sm:$0xf]  ;;  %v404_v53 = vld [vmem:[%s2387_s18 + $0x2d0] sm:$0xf] }
  0x32   : > { %359 = vst [vmem:[%s2391_s19 + $0x58] sm:$0xf] %v358_v30  ;;  %v406_v54 = vld [vmem:[%s2387_s18 + $0x2e0] sm:$0xf]  ;;  %v408_v55 = vld [vmem:[%s2387_s18 + $0x2f0] sm:$0xf] }
  0x33   : > { %361 = vst [vmem:[%s2391_s19 + $0x5c] sm:$0xf] %v360_v31  ;;  %v410_v56 = vld [vmem:[%s2387_s18 + $0x300] sm:$0xf]  ;;  %v412_v57 = vld [vmem:[%s2387_s18 + $0x310] sm:$0xf] }
  0x34   : > { %363 = vst [vmem:[%s2391_s19 + $0x60] sm:$0xf] %v362_v32  ;;  %v414_v58 = vld [vmem:[%s2387_s18 + $0x320] sm:$0xf]  ;;  %v416_v59 = vld [vmem:[%s2387_s18 + $0x330] sm:$0xf] }
  0x35   : > { %365 = vst [vmem:[%s2391_s19 + $0x64] sm:$0xf] %v364_v33  ;;  %v418_v60 = vld [vmem:[%s2387_s18 + $0x340] sm:$0xf]  ;;  %v420_v61 = vld [vmem:[%s2387_s18 + $0x350] sm:$0xf] }
  0x36   : > { %367 = vst [vmem:[%s2391_s19 + $0x68] sm:$0xf] %v366_v34  ;;  %v422_v62 = vld [vmem:[%s2387_s18 + $0x360] sm:$0xf]  ;;  %v424_v63 = vld [vmem:[%s2387_s18 + $0x370] sm:$0xf] }
  0x37   : > { %369 = vst [vmem:[%s2391_s19 + $0x6c] sm:$0xf] %v368_v35  ;;  %v426_v0 = vld [vmem:[%s2387_s18 + $0x380] sm:$0xf]  ;;  %v428_v1 = vld [vmem:[%s2387_s18 + $0x390] sm:$0xf] }
  0x38   : > { %371 = vst [vmem:[%s2391_s19 + $0x70] sm:$0xf] %v370_v36  ;;  %v430_v2 = vld [vmem:[%s2387_s18 + $0x3a0] sm:$0xf]  ;;  %v432_v3 = vld [vmem:[%s2387_s18 + $0x3b0] sm:$0xf] }
  0x39   : > { %373 = vst [vmem:[%s2391_s19 + $0x74] sm:$0xf] %v372_v37  ;;  %v434_v4 = vld [vmem:[%s2387_s18 + $0x3c0] sm:$0xf]  ;;  %v436_v5 = vld [vmem:[%s2387_s18 + $0x3d0] sm:$0xf] }
  0x3a   : > { %375 = vst [vmem:[%s2391_s19 + $0x78] sm:$0xf] %v374_v38  ;;  %v438_v6 = vld [vmem:[%s2387_s18 + $0x3e0] sm:$0xf]  ;;  %v440_v7 = vld [vmem:[%s2387_s18 + $0x3f0] sm:$0xf] }
  0x3b   : > { %377 = vst [vmem:[%s2391_s19 + $0x7c] sm:$0xf] %v376_v39 }
  0x3c   : > { %379 = vst [vmem:[%s2391_s19 + $0x80] sm:$0xf] %v378_v40 }
  0x3d   : > { %381 = vst [vmem:[%s2391_s19 + $0x84] sm:$0xf] %v380_v41 }
  0x3e   : > { %383 = vst [vmem:[%s2391_s19 + $0x88] sm:$0xf] %v382_v42 }
  0x3f   : > { %385 = vst [vmem:[%s2391_s19 + $0x8c] sm:$0xf] %v384_v43 }
  0x40   : > { %387 = vst [vmem:[%s2391_s19 + $0x90] sm:$0xf] %v386_v44 }
  0x41   : > { %389 = vst [vmem:[%s2391_s19 + $0x94] sm:$0xf] %v388_v45 }
  0x42   : > { %391 = vst [vmem:[%s2391_s19 + $0x98] sm:$0xf] %v390_v46 }
  0x43   : > { %393 = vst [vmem:[%s2391_s19 + $0x9c] sm:$0xf] %v392_v47 }
  0x44   : > { %395 = vst [vmem:[%s2391_s19 + $0xa0] sm:$0xf] %v394_v48 }
  0x45   : > { %397 = vst [vmem:[%s2391_s19 + $0xa4] sm:$0xf] %v396_v49 }
  0x46   : > { %399 = vst [vmem:[%s2391_s19 + $0xa8] sm:$0xf] %v398_v50 }
  0x47   : > { %401 = vst [vmem:[%s2391_s19 + $0xac] sm:$0xf] %v400_v51 }
  0x48   : > { %403 = vst [vmem:[%s2391_s19 + $0xb0] sm:$0xf] %v402_v52 }
  0x49   : > { %405 = vst [vmem:[%s2391_s19 + $0xb4] sm:$0xf] %v404_v53 }
  0x4a   : > { %407 = vst [vmem:[%s2391_s19 + $0xb8] sm:$0xf] %v406_v54 }
  0x4b   : > { %409 = vst [vmem:[%s2391_s19 + $0xbc] sm:$0xf] %v408_v55 }
  0x4c   : > { %411 = vst [vmem:[%s2391_s19 + $0xc0] sm:$0xf] %v410_v56 }
  0x4d   : > { %413 = vst [vmem:[%s2391_s19 + $0xc4] sm:$0xf] %v412_v57 }
  0x4e   : > { %415 = vst [vmem:[%s2391_s19 + $0xc8] sm:$0xf] %v414_v58 }
  0x4f   : > { %417 = vst [vmem:[%s2391_s19 + $0xcc] sm:$0xf] %v416_v59 }
  0x50   : > { %419 = vst [vmem:[%s2391_s19 + $0xd0] sm:$0xf] %v418_v60 }
  0x51   : > { %421 = vst [vmem:[%s2391_s19 + $0xd4] sm:$0xf] %v420_v61 }
  0x52   : > { %423 = vst [vmem:[%s2391_s19 + $0xd8] sm:$0xf] %v422_v62 }
  0x53   : > { %425 = vst [vmem:[%s2391_s19 + $0xdc] sm:$0xf] %v424_v63 }
  0x54   : > { %427 = vst [vmem:[%s2391_s19 + $0xe0] sm:$0xf] %v426_v0 }
  0x55   : > { %429 = vst [vmem:[%s2391_s19 + $0xe4] sm:$0xf] %v428_v1 }
  0x56   : > { %431 = vst [vmem:[%s2391_s19 + $0xe8] sm:$0xf] %v430_v2 }
  0x57   : > { %433 = vst [vmem:[%s2391_s19 + $0xec] sm:$0xf] %v432_v3 }
  0x58   : > { %435 = vst [vmem:[%s2391_s19 + $0xf0] sm:$0xf] %v434_v4 }
  0x59   : > { %437 = vst [vmem:[%s2391_s19 + $0xf4] sm:$0xf] %v436_v5 }
  0x5a   : > { %439 = vst [vmem:[%s2391_s19 + $0xf8] sm:$0xf] %v438_v6 }
  0x5b   : > { %441 = vst [vmem:[%s2391_s19 + $0xfc] sm:$0xf] %v440_v7 }
  0x5c PF: > { %p1794_p5 = scmp.ge.s32.totalorder %s2297_s23, 1  ;;  %p602_p6 = scmp.lt.s32.totalorder %s2297_s23, 5 }
  0x5e   : > { %p603_p7 = pnand %p1794_p5, %p602_p6 }
  0x5f   : > { %s609_s20 = sand.u32 (!%p603_p7), 1, %s2289_s21   ;;  %s1797_s26 = sshll.u32 (!%p603_p7), %s2354_s24, 4 }
  0x60   : > { %606 = sbr.rel (%p603_p7) target bundleno = 672 (0x2a0), region = 115  ;;  %s1796_s27 = sshll.u32 (!%p603_p7), %s609_s20, 8 }
  0x61   : > { %p663_p8 = scmp.lt.s32.totalorder (!%p603_p7), %s1797_s26, 63  ;;  %s2525_s29 = scalar_lea.vmem (!%p603_p7), [#allocation3], %s1796_s27 }
  0x62   : > { %p656_p9 = scmp.lt.s32.totalorder (!%p603_p7), %s2354_s24, 3  ;;  %s1795_s12 = sshll.u32 (!%p603_p7), %s609_s20, 6 }
  0x63   : > { %s611_s15 = scalar_lea.vmem (!%p603_p7), [#allocation2], %s1795_s12  ;;  %p1992_p10 = scmp.ne.s32.totalorder (!%p603_p7), %s2354_s24, 0 }
  0x65   : > { %s2794_s26 = smov (!%p663_p8, %s1797_s26), 63  ;;  %v2149_v8 = vld [vmem:[%s2525_s29 + $0x38] sm:$0xff]  ;;  %v2148_v12 = vld [vmem:[%s2525_s29 + $0x30] sm:$0xff]  ;;  %v2147_v16 = vld [vmem:[%s2525_s29 + $0x28] sm:$0xff] }
  0x66   : > { %v2157_v9 = vld [vmem:[%s2525_s29 + $0x78] sm:$0xff]  ;;  %s2125_s23 = sshll.u32 %s2794_s26, 4  ;;  %1021 = vmatpush.bf16.msra.mxu0 %v2149_v8  ;;  %v2156_v13 = vld [vmem:[%s2525_s29 + $0x70] sm:$0xff]  ;;  %v2155_v17 = vld [vmem:[%s2525_s29 + $0x68] sm:$0xff] }
  0x67   : > { %v2165_v10 = vld [vmem:[%s2525_s29 + $0xb8] sm:$0xff]  ;;  %1050 = vmatpush.bf16.msra.mxu1 %v2157_v9  ;;  %s2536_s8 = scalar_lea.vmem %s2787_s5, %s2125_s23  ;;  %v2164_v14 = vld [vmem:[%s2525_s29 + $0xb0] sm:$0xff]  ;;  %v2163_v18 = vld [vmem:[%s2525_s29 + $0xa8] sm:$0xff] }
  0x68   : > { %v2173_v11 = vld [vmem:[%s2525_s29 + $0xf8] sm:$0xff]  ;;  %1079 = vmatpush.bf16.msra.mxu2 %v2165_v10  ;;  %v2172_v15 = vld [vmem:[%s2525_s29 + $0xf0] sm:$0xff]  ;;  %v2171_v19 = vld [vmem:[%s2525_s29 + $0xe8] sm:$0xff] }
  0x69   : > { %1108 = vmatpush.bf16.msra.mxu3 %v2173_v11  ;;  %v2146_v20 = vld [vmem:[%s2525_s29 + $0x20] sm:$0xff]  ;;  %v2145_v24 = vld [vmem:[%s2525_s29 + $0x18] sm:$0xff]  ;;  %v2144_v28 = vld [vmem:[%s2525_s29 + $0x10] sm:$0xff] }
  0x6a   : > { %1022 = vmatpush.bf16.msra.mxu0 %v2148_v12  ;;  %v2154_v21 = vld [vmem:[%s2525_s29 + $0x60] sm:$0xff]  ;;  %v2153_v25 = vld [vmem:[%s2525_s29 + $0x58] sm:$0xff]  ;;  %v2152_v29 = vld [vmem:[%s2525_s29 + $0x50] sm:$0xff] }
  0x6b   : > { %1051 = vmatpush.bf16.msra.mxu1 %v2156_v13  ;;  %v2162_v22 = vld [vmem:[%s2525_s29 + $0xa0] sm:$0xff]  ;;  %v2161_v26 = vld [vmem:[%s2525_s29 + $0x98] sm:$0xff]  ;;  %v2160_v30 = vld [vmem:[%s2525_s29 + $0x90] sm:$0xff] }
  0x6c   : > { %1080 = vmatpush.bf16.msra.mxu2 %v2164_v14  ;;  %v2170_v23 = vld [vmem:[%s2525_s29 + $0xe0] sm:$0xff]  ;;  %v2169_v27 = vld [vmem:[%s2525_s29 + $0xd8] sm:$0xff]  ;;  %v2168_v31 = vld [vmem:[%s2525_s29 + $0xd0] sm:$0xff] }
  0x6d   : > { %1109 = vmatpush.bf16.msra.mxu3 %v2172_v15  ;;  %v2143_v32 = vld [vmem:[%s2525_s29 + $0x8] sm:$0xff]  ;;  %v2142_v36 = vld [vmem:[%s2525_s29] sm:$0xff]  ;;  %v2128_v38 = vld [vmem:[%s2782_s0 + $0xc] sm:$0xf0] }
  0x6e   : > { %1023 = vmatpush.bf16.msra.mxu0 %v2147_v16  ;;  %v2151_v33 = vld [vmem:[%s2525_s29 + $0x48] sm:$0xff]  ;;  %v1802_v37 = vld [vmem:[%s2782_s0] sm:$0xf]  ;;  %v2126_v42 = vld [vmem:[%s2782_s0 + $0x4] sm:$0xf] }
  0x6f   : > { %1052 = vmatpush.bf16.msra.mxu1 %v2155_v17  ;;  %v2159_v34 = vld [vmem:[%s2525_s29 + $0x88] sm:$0xff]  ;;  %v2150_v39 = vld [vmem:[%s2525_s29 + $0x40] sm:$0xff]  ;;  %v1804_v43 = vld [vmem:[%s2782_s0 + $0x10] sm:$0xf0]  ;;  %v1803_v48 = vor.u32 %v2128_v38, %v1802_v37 }
  0x70   : > { %1081 = vmatpush.bf16.msra.mxu2 %v2163_v18  ;;  %v2167_v35 = vld [vmem:[%s2525_s29 + $0xc8] sm:$0xff]  ;;  %v2158_v40 = vld [vmem:[%s2525_s29 + $0x80] sm:$0xff]  ;;  %v2129_v45 = vld [vmem:[%s2782_s0 + $0x14] sm:$0xf0]  ;;  %v1807_v49 = vor.u32 %v2126_v42, %v1804_v43 }
  0x71   : > { %1110 = vmatpush.bf16.msra.mxu3 %v2171_v19  ;;  %v2166_v41 = vld [vmem:[%s2525_s29 + $0xc0] sm:$0xff]  ;;  %v1810_v44 = vld [vmem:[%s2782_s0 + $0x8] sm:$0xf]  ;;  %v2127_v46 = vld [vmem:[%s2782_s0 + $0xc] sm:$0xf]  ;;  %s2662_s29 = scalar_select %p656_p9, %s2354_s24, 3 }
  0x72   : > { %1024 = vmatpush.bf16.msra.mxu0 %v2146_v20  ;;  %v1812_v47 = vld [vmem:[%s2782_s0 + $0x18] sm:$0xf0]  ;;  %v1811_v50 = vor.u32 %v2129_v45, %v1810_v44  ;;  %v1818_v52 = vld [vmem:[%s2782_s0 + $0x20] sm:$0xf]  ;;  %v2132_v53 = vld [vmem:[%s2782_s0 + $0x2c] sm:$0xf0] }
  0x73   : > { %1053 = vmatpush.bf16.msra.mxu1 %v2154_v21  ;;  %v1815_v51 = vor.u32 %v2127_v46, %v1812_v47  ;;  %v2130_v54 = vld [vmem:[%s2782_s0 + $0x24] sm:$0xf]  ;;  %v1820_v55 = vld [vmem:[%s2782_s0 + $0x30] sm:$0xf0]  ;;  %v1826_v56 = vld [vmem:[%s2782_s0 + $0x28] sm:$0xf]  ;;  %v1819_v60 = vor.u32 %v2132_v53, %v1818_v52  ;;  %s661_s7 = scalar_lea.vmem %s2785_s3, %s2662_s29  ;;  %s658_s11 = scalar_lea.vmem %s2784_s2, %s2662_s29 }
  0x74   : > { %1082 = vmatpush.bf16.msra.mxu2 %v2162_v22  ;;  %v2133_v57 = vld [vmem:[%s2782_s0 + $0x34] sm:$0xf0]  ;;  %v2131_v58 = vld [vmem:[%s2782_s0 + $0x2c] sm:$0xf]  ;;  %v1828_v59 = vld [vmem:[%s2782_s0 + $0x38] sm:$0xf0]  ;;  %v1823_v61 = vor.u32 %v2130_v54, %v1820_v55 }
  0x75   : > { %1111 = vmatpush.bf16.msra.mxu3 %v2170_v23  ;;  %v1827_v62 = vor.u32 %v2133_v57, %v1826_v56  ;;  %v1831_v63 = vor.u32 %v2131_v58, %v1828_v59  ;;  %v1834_v0 = vld [vmem:[%s2782_s0 + $0x40] sm:$0xf]  ;;  %v2136_v1 = vld [vmem:[%s2782_s0 + $0x4c] sm:$0xf0]  ;;  %v2134_v2 = vld [vmem:[%s2782_s0 + $0x44] sm:$0xf] }
  0x76   : > { %1025 = vmatpush.bf16.msra.mxu0 %v2145_v24  ;;  %v1836_v3 = vld [vmem:[%s2782_s0 + $0x50] sm:$0xf0]  ;;  %v1842_v4 = vld [vmem:[%s2782_s0 + $0x48] sm:$0xf]  ;;  %v2137_v5 = vld [vmem:[%s2782_s0 + $0x54] sm:$0xf0]  ;;  %v1835_v8 = vor.u32 %v2136_v1, %v1834_v0 }
  0x77   : > { %1054 = vmatpush.bf16.msra.mxu1 %v2153_v25  ;;  %v2135_v6 = vld [vmem:[%s2782_s0 + $0x4c] sm:$0xf]  ;;  %v1844_v7 = vld [vmem:[%s2782_s0 + $0x58] sm:$0xf0]  ;;  %v1839_v9 = vor.u32 %v2134_v2, %v1836_v3  ;;  %v1843_v10 = vor.u32 %v2137_v5, %v1842_v4  ;;  %v1850_v12 = vld [vmem:[%s2782_s0 + $0x60] sm:$0xf] }
  0x78   : > { %1083 = vmatpush.bf16.msra.mxu2 %v2161_v26  ;;  %v1847_v11 = vor.u32 %v2135_v6, %v1844_v7  ;;  %v2140_v13 = vld [vmem:[%s2782_s0 + $0x6c] sm:$0xf0]  ;;  %v2138_v14 = vld [vmem:[%s2782_s0 + $0x64] sm:$0xf]  ;;  %v1852_v15 = vld [vmem:[%s2782_s0 + $0x70] sm:$0xf0] }
  0x79   : > { %1112 = vmatpush.bf16.msra.mxu3 %v2169_v27  ;;  %v1858_v16 = vld [vmem:[%s2782_s0 + $0x68] sm:$0xf]  ;;  %v2141_v17 = vld [vmem:[%s2782_s0 + $0x74] sm:$0xf0]  ;;  %v2139_v18 = vld [vmem:[%s2782_s0 + $0x6c] sm:$0xf]  ;;  %v1851_v20 = vor.u32 %v2140_v13, %v1850_v12  ;;  %v1855_v21 = vor.u32 %v2138_v14, %v1852_v15 }
  0x7a   : > { %1026 = vmatpush.bf16.msra.mxu0 %v2144_v28  ;;  %v1860_v19 = vld [vmem:[%s2782_s0 + $0x78] sm:$0xf0]  ;;  %v1859_v22 = vor.u32 %v2141_v17, %v1858_v16 }
  0x7b   : > { %1055 = vmatpush.bf16.msra.mxu1 %v2152_v29  ;;  %v1863_v23 = vor.u32 %v2139_v18, %v1860_v19 }
  0x7c   : > { %1084 = vmatpush.bf16.msra.mxu2 %v2160_v30 }
  0x7d   : > { %1113 = vmatpush.bf16.msra.mxu3 %v2168_v31 }
  0x7e   : > { %1027 = vmatpush.bf16.msra.mxu0 %v2143_v32 }
  0x7f   : > { %1056 = vmatpush.bf16.msra.mxu1 %v2151_v33 }
  0x80   : > { %1085 = vmatpush.bf16.msra.mxu2 %v2159_v34 }
  0x81   : > { %1114 = vmatpush.bf16.msra.mxu3 %v2167_v35 }
  0x82   : > { %1028 = vmatpush.bf16.msra.mxu0 %v2142_v36 }
  0x83   : > { %1057 = vmatpush.bf16.msra.mxu1 %v2150_v39 }
  0x84   : > { %1086 = vmatpush.bf16.msra.mxu2 %v2158_v40 }
  0x85   : > { %1115 = vmatpush.bf16.msra.mxu3 %v2166_v41  ;;  %1029 = vmatmul.bf16.vlgmr.msra.gmra.mxu0 %v1803_v48 }
  0x86   : > { %1058 = vmatmul.bf16.vlgmr.msra.gmra.mxu1 %v1807_v49 }
  0x87   : > { %1087 = vmatmul.bf16.vlgmr.msra.gmra.mxu2 %v1811_v50 }
  0x88   : > { %1116 = vmatmul.bf16.vlgmr.msra.gmra.mxu3 %v1815_v51 }
  0x95   : > { %1034 = vmatmul.bf16.gmra.mxu0 %v1819_v60 }
  0x96   : > { %1063 = vmatmul.bf16.gmra.mxu1 %v1823_v61 }
  0x97   : > { %1092 = vmatmul.bf16.gmra.mxu2 %v1827_v62 }
  0x98   : > { %1121 = vmatmul.bf16.gmra.mxu3 %v1831_v63 }
  0xa5   : > { %1039 = vmatmul.bf16.gmra.mxu0 %v1835_v8 }
  0xa6   : > { %1068 = vmatmul.bf16.gmra.mxu1 %v1839_v9 }
  0xa7   : > { %1097 = vmatmul.bf16.gmra.mxu2 %v1843_v10 }
  0xa8   : > { %1126 = vmatmul.bf16.gmra.mxu3 %v1847_v11 }
  0xb5   : > { %1044 = vmatmul.bf16.gmra.mxu0 %v1851_v20 }
  0xb6   : > { %1073 = vmatmul.bf16.gmra.mxu1 %v1855_v21 }
  0xb7   : > { %1102 = vmatmul.bf16.gmra.mxu2 %v1859_v22 }
  0xb8   : > { %1131 = vmatmul.bf16.gmra.mxu3 %v1863_v23 }
 0x102   : > { %v1030_v24 = vpop.f32.mrf.mxu0 }
 0x103   : > { %v1059_v25 = vpop.f32.mrf.mxu1 }
 0x104   : > { %v1060_v46 = vadd.f32 %v1059_v25, %v1030_v24 }
 0x10a   : > { %v1088_v26 = vpop.f32.mrf.mxu2  ;;  %v1032_v28 = vpop.f32.mrf.mxu0 }
 0x10b   : > { %v1117_v27 = vpop.f32.mrf.mxu3  ;;  %v1061_v29 = vpop.f32.mrf.mxu1  ;;  %v1089_v52 = vadd.f32 %v1088_v26, %v1060_v46 }
 0x10c   : > { %v1062_v47 = vadd.f32 %v1061_v29, %v1032_v28 }
 0x10d   : > { %v1118_v60 = vadd.f32 %v1117_v27, %v1089_v52 }
 0x112   : > { %v1090_v30 = vpop.f32.mrf.mxu2  ;;  %v1035_v32 = vpop.f32.mrf.mxu0 }
 0x113   : > { %v1119_v31 = vpop.f32.mrf.mxu3  ;;  %v1064_v33 = vpop.f32.mrf.mxu1  ;;  %v1091_v51 = vadd.f32 %v1090_v30, %v1062_v47 }
 0x114   : > { %v1065_v48 = vadd.f32 %v1064_v33, %v1035_v32 }
 0x115   : > { %v1120_v58 = vadd.f32 %v1119_v31, %v1091_v51 }
 0x117   : > { %v1137_v3 = vadd.f32 %v1120_v58, %v1118_v60 }
 0x11a   : > { %v1093_v34 = vpop.f32.mrf.mxu2  ;;  %v1037_v36 = vpop.f32.mrf.mxu0 }
 0x11b   : > { %v1122_v35 = vpop.f32.mrf.mxu3  ;;  %v1066_v37 = vpop.f32.mrf.mxu1  ;;  %v1094_v55 = vadd.f32 %v1093_v34, %v1065_v48 }
 0x11c   : > { %v1067_v56 = vadd.f32 %v1066_v37, %v1037_v36 }
 0x11d   : > { %v1123_v61 = vadd.f32 %v1122_v35, %v1094_v55 }
 0x11f   : > { %v1138_v6 = vadd.f32 %v1137_v3, %v1123_v61  ;;  %v1192_v3 = vld [vmem:[%s658_s11] sm:$0x1] }
 0x122   : > { %v1095_v38 = vpop.f32.mrf.mxu2  ;;  %v1040_v40 = vpop.f32.mrf.mxu0 }
 0x123   : > { %v1124_v39 = vpop.f32.mrf.mxu3  ;;  %v1069_v41 = vpop.f32.mrf.mxu1  ;;  %v1096_v59 = vadd.f32 %v1095_v38, %v1067_v56 }
 0x124   : > { %v1070_v57 = vadd.f32 %v1069_v41, %v1040_v40 }
 0x125   : > { %v1125_v4 = vadd.f32 %v1124_v39, %v1096_v59 }
 0x127   : > { %v1139_v11 = vadd.f32 %v1138_v6, %v1125_v4 }
 0x12a   : > { %v1098_v42 = vpop.f32.mrf.mxu2  ;;  %v1042_v44 = vpop.f32.mrf.mxu0 }
 0x12b   : > { %v1127_v43 = vpop.f32.mrf.mxu3  ;;  %v1071_v45 = vpop.f32.mrf.mxu1  ;;  %v1099_v62 = vadd.f32 %v1098_v42, %v1070_v57 }
 0x12c   : > { %v1072_v63 = vadd.f32 %v1071_v45, %v1042_v44 }
 0x12d   : > { %v1128_v7 = vadd.f32 %v1127_v43, %v1099_v62 }
 0x12f   : > { %v1140_v13 = vadd.f32 %v1139_v11, %v1128_v7 }
 0x132   : > { %v1100_v49 = vpop.f32.mrf.mxu2  ;;  %v1045_v53 = vpop.f32.mrf.mxu0 }
 0x133   : > { %v1129_v50 = vpop.f32.mrf.mxu3  ;;  %v1074_v54 = vpop.f32.mrf.mxu1  ;;  %v1101_v5 = vadd.f32 %v1100_v49, %v1072_v63 }
 0x134   : > { %v1075_v0 = vadd.f32 %v1074_v54, %v1045_v53 }
 0x135   : > { %v1130_v12 = vadd.f32 %v1129_v50, %v1101_v5 }
 0x137   : > { %v1141_v17 = vadd.f32 %v1140_v13, %v1130_v12  ;;  %v1216_v13 = vld [vmem:[%s611_s15 + $0x8] sm:$0xff] }
 0x13a   : > { %v1103_v1 = vpop.f32.mrf.mxu2  ;;  %v1047_v9 = vpop.f32.mrf.mxu0 }
 0x13b   : > { %v1132_v2 = vpop.f32.mrf.mxu3  ;;  %v1104_v8 = vadd.f32 %v1103_v1, %v1075_v0  ;;  %v1076_v10 = vpop.f32.mrf.mxu1 }
 0x13c   : > { %v1077_v15 = vadd.f32 %v1076_v10, %v1047_v9 }
 0x13d   : > { %v1133_v14 = vadd.f32 %v1132_v2, %v1104_v8 }
 0x13f   : > { %v1142_v20 = vadd.f32 %v1141_v17, %v1133_v14 }
 0x142   : > { %v1105_v16 = vpop.f32.mrf.mxu2 }
 0x143   : > { %v1106_v18 = vadd.f32 %v1105_v16, %v1077_v15  ;;  %v1134_v19 = vpop.f32.mrf.mxu3 }
 0x145   : > { %v1135_v21 = vadd.f32 %v1134_v19, %v1106_v18  ;;  %v1217_v18 = vld [vmem:[%s611_s15 + $0x10] sm:$0xff]  ;;  %v1218_v19 = vld [vmem:[%s611_s15 + $0x18] sm:$0xff] }
 0x147   : > { %v1143_v22 = vadd.f32 %v1142_v20, %v1135_v21  ;;  %v1219_v20 = vld [vmem:[%s611_s15 + $0x20] sm:$0xff] }
 0x149   : > { %v1144_v23 = vrot.slane %v1143_v22, 4 }
 0x14b   : > { %v1145_v24 = vadd.f32 %v1144_v23, %v1143_v22 }
 0x14d   : > { %v1146_v25 = vrot.slane %v1145_v24, 2 }
 0x14f   : > { %v1147_v26 = vadd.f32 %v1146_v25, %v1145_v24  ;;  %v1220_v25 = vld [vmem:[%s611_s15 + $0x28] sm:$0xff] }
 0x151   : > { %v1148_v27 = vrot.slane %v1147_v26, 1 }
 0x153   : > { %v1149_v28 = vadd.f32 %v1148_v27, %v1147_v26  ;;  %v1221_v26 = vld [vmem:[%s611_s15 + $0x30] sm:$0xff]  ;;  %v1222_v27 = vld [vmem:[%s611_s15 + $0x38] sm:$0xff] }
 0x155   : > { %v1150_v29 = vmul.f32 0.015625, %v1149_v28 }
 0x157   : > { %v1151_v30 = vsub.f32 %v1118_v60, %v1150_v29  ;;  %v1152_v31 = vsub.f32 %v1120_v58, %v1150_v29  ;;  %v1153_v32 = vsub.f32 %v1123_v61, %v1150_v29  ;;  %v1154_v33 = vsub.f32 %v1125_v4, %v1150_v29 }
 0x158   : > { %v1155_v36 = vsub.f32 %v1128_v7, %v1150_v29  ;;  %v1156_v39 = vsub.f32 %v1130_v12, %v1150_v29  ;;  %v1157_v42 = vsub.f32 %v1133_v14, %v1150_v29  ;;  %v1158_v45 = vsub.f32 %v1135_v21, %v1150_v29  ;;  %v2240_v7 = vld [vmem:[%s661_s7] ss:$0 sm:$0xff] }
 0x159   : > { %v1159_v34 = vmul.f32 %v1151_v30, %v1151_v30  ;;  %v1160_v35 = vmul.f32 %v1152_v31, %v1152_v31  ;;  %v1161_v37 = vmul.f32 %v1153_v32, %v1153_v32  ;;  %v1162_v40 = vmul.f32 %v1154_v33, %v1154_v33  ;;  %v1215_v12 = vld [vmem:[%s611_s15] sm:$0xff] }
 0x15a   : > { %v1163_v43 = vmul.f32 %v1155_v36, %v1155_v36  ;;  %v1164_v46 = vmul.f32 %v1156_v39, %v1156_v39  ;;  %v1165_v48 = vmul.f32 %v1157_v42, %v1157_v42  ;;  %v1166_v50 = vmul.f32 %v1158_v45, %v1158_v45 }
 0x15b   : > { %v1167_v38 = vadd.f32 %v1160_v35, %v1159_v34 }
 0x15d   : > { %v1168_v41 = vadd.f32 %v1167_v38, %v1161_v37 }
 0x15f   : > { %v1169_v44 = vadd.f32 %v1168_v41, %v1162_v40 }
 0x161   : > { %v1170_v47 = vadd.f32 %v1169_v44, %v1163_v43 }
 0x163   : > { %v1171_v49 = vadd.f32 %v1170_v47, %v1164_v46 }
 0x165   : > { %v1172_v51 = vadd.f32 %v1171_v49, %v1165_v48 }
 0x167   : > { %v1173_v52 = vadd.f32 %v1172_v51, %v1166_v50 }
 0x169   : > { %v1174_v53 = vrot.slane %v1173_v52, 4 }
 0x16b   : > { %v1175_v54 = vadd.f32 %v1174_v53, %v1173_v52 }
 0x16d   : > { %v1176_v55 = vrot.slane %v1175_v54, 2 }
 0x16f   : > { %v1177_v56 = vadd.f32 %v1176_v55, %v1175_v54 }
 0x171   : > { %v1178_v57 = vrot.slane %v1177_v56, 1 }
 0x173   : > { %v1179_v58 = vadd.f32 %v1178_v57, %v1177_v56 }
 0x175   : > { %v1180_v59 = vmul.f32 0.015625, %v1179_v58 }
 0x177   : > { %v1181_v60 = vadd.f32 1e-05, %v1180_v59 }
 0x179   : > { %2241 = vrsqrt.f32 %v1181_v60  ;;  %vm1188_vm1 = vweird.f32 %v1181_v60 }
 0x17f   : > { %v2242_v61 = vpop.eup %2241 }
 0x180   : > { %v1183_v62 = vmul.f32 %v2242_v61, %v1181_v60  ;;  %vm1189_vm0 = vweird.f32 %v2242_v61 }
 0x181   : > { %vm1190_vm2 = vmor %vm1188_vm1, %vm1189_vm0 }
 0x182   : > { %v1184_v63 = vmul.f32 %v2242_v61, %v1183_v62 }
 0x184   : > { %v1185_v0 = vmul.f32 0.5, %v1184_v63 }
 0x186   : > { %v1186_v1 = vsub.f32 1.5, %v1185_v0 }
 0x188   : > { %v1187_v2 = vmul.f32 %v2242_v61, %v1186_v1 }
 0x18a   : > { %v1191_v4 = vsel %vm1190_vm2, %v2242_v61, %v1187_v2 }
 0x18b   : > { %v1193_v5 = vmul.f32 %v1192_v3, %v1191_v4 }
 0x18d   : > { %v1194_v6 = vperm.slane %v1193_v5, 0 }
 0x18f   : > { %v1195_v8 = vmul.f32 %v1194_v6, %v1151_v30  ;;  %v1196_v9 = vmul.f32 %v1194_v6, %v1152_v31  ;;  %v1197_v10 = vmul.f32 %v1194_v6, %v1153_v32  ;;  %v1198_v11 = vmul.f32 %v1194_v6, %v1154_v33 }
 0x190   : > { %v1199_v14 = vmul.f32 %v1194_v6, %v1155_v36  ;;  %v1200_v15 = vmul.f32 %v1194_v6, %v1156_v39  ;;  %v1201_v16 = vmul.f32 %v1194_v6, %v1157_v42  ;;  %v1202_v17 = vmul.f32 %v1194_v6, %v1158_v45 }
 0x191   : > { %v1207_v21 = vadd.f32 %v2240_v7, %v1195_v8  ;;  %v1208_v22 = vadd.f32 %v2240_v7, %v1196_v9  ;;  %v1209_v23 = vadd.f32 %v2240_v7, %v1197_v10  ;;  %v1210_v24 = vadd.f32 %v2240_v7, %v1198_v11 }
 0x192   : > { %v1211_v28 = vadd.f32 %v2240_v7, %v1199_v14  ;;  %v1212_v29 = vadd.f32 %v2240_v7, %v1200_v15  ;;  %v1213_v30 = vadd.f32 %v2240_v7, %v1201_v16  ;;  %v1214_v31 = vadd.f32 %v2240_v7, %v1202_v17 }
 0x193   : > { %v1223_v32 = vadd.f32 %v1215_v12, %v1207_v21  ;;  %v1224_v33 = vadd.f32 %v1216_v13, %v1208_v22  ;;  %v1225_v34 = vadd.f32 %v1217_v18, %v1209_v23  ;;  %v1226_v35 = vadd.f32 %v1218_v19, %v1210_v24 }
 0x194   : > { %v1227_v36 = vadd.f32 %v1219_v20, %v1211_v28  ;;  %v1228_v37 = vadd.f32 %v1220_v25, %v1212_v29  ;;  %v1229_v38 = vadd.f32 %v1221_v26, %v1213_v30  ;;  %v1230_v39 = vadd.f32 %v1222_v27, %v1214_v31  ;;  %1246 = sbr.rel (%p1992_p10) target bundleno = 442 (0x1ba), region = 127 }
 0x195   : > { %v1231_v40 = vmax.f32 %v1223_v32, 0.0  ;;  %v1232_v41 = vmax.f32 %v1224_v33, 0.0  ;;  %v1233_v42 = vmax.f32 %v1225_v34, 0.0  ;;  %v1234_v43 = vmax.f32 %v1226_v35, 0.0 }
 0x196   : > { %v1235_v44 = vmax.f32 %v1227_v36, 0.0  ;;  %v1236_v45 = vmax.f32 %v1228_v37, 0.0  ;;  %v1237_v46 = vmax.f32 %v1229_v38, 0.0  ;;  %v1238_v47 = vmax.f32 %v1230_v39, 0.0 }
 0x197   : > { %v2679_v48 = vpack.c.bf16 %v1232_v41, %v1231_v40  ;;  %v2681_v49 = vpack.c.bf16 %v1234_v43, %v1233_v42 }
 0x198   : > { %v2683_v50 = vpack.c.bf16 %v1236_v45, %v1235_v44  ;;  %v2685_v51 = vpack.c.bf16 %v1238_v47, %v1237_v46 }
 0x199   : > { %v2299_v52 = vmov 0.0  }
 0x19a   : > { %1247 = vst [vmem:[#allocation4] sm:$0xff] %v2299_v52 }
 0x19b   : > { %1248 = vst [vmem:[#allocation4 + $0x8] sm:$0xff] %v2299_v52 }
 0x19c   : > { %1249 = vst [vmem:[#allocation4 + $0x10] sm:$0xff] %v2299_v52 }
 0x19d   : > { %1250 = vst [vmem:[#allocation4 + $0x18] sm:$0xff] %v2299_v52 }
 0x19e   : > { %1251 = vst [vmem:[#allocation4 + $0x20] sm:$0xff] %v2299_v52 }
 0x19f   : > { %1252 = vst [vmem:[#allocation4 + $0x28] sm:$0xff] %v2299_v52 }
 0x1a0   : > { %1253 = vst [vmem:[#allocation4 + $0x30] sm:$0xff] %v2299_v52 }
 0x1a1   : > { %1254 = vst [vmem:[#allocation4 + $0x38] sm:$0xff] %v2299_v52 }
 0x1a2   : > { %1255 = vst [vmem:[#allocation4 + $0x40] sm:$0xff] %v2299_v52 }
 0x1a3   : > { %1256 = vst [vmem:[#allocation4 + $0x48] sm:$0xff] %v2299_v52 }
 0x1a4   : > { %1257 = vst [vmem:[#allocation4 + $0x50] sm:$0xff] %v2299_v52 }
 0x1a5   : > { %1258 = vst [vmem:[#allocation4 + $0x58] sm:$0xff] %v2299_v52 }
 0x1a6   : > { %1259 = vst [vmem:[#allocation4 + $0x60] sm:$0xff] %v2299_v52 }
 0x1a7   : > { %1260 = vst [vmem:[#allocation4 + $0x68] sm:$0xff] %v2299_v52 }
 0x1a8   : > { %1261 = vst [vmem:[#allocation4 + $0x70] sm:$0xff] %v2299_v52 }
 0x1a9   : > { %1262 = vst [vmem:[#allocation4 + $0x78] sm:$0xff] %v2299_v52 }
 0x1aa   : > { %1263 = vst [vmem:[#allocation4 + $0x80] sm:$0xff] %v2299_v52 }
 0x1ab   : > { %1264 = vst [vmem:[#allocation4 + $0x88] sm:$0xff] %v2299_v52 }
 0x1ac   : > { %1265 = vst [vmem:[#allocation4 + $0x90] sm:$0xff] %v2299_v52 }
 0x1ad   : > { %1266 = vst [vmem:[#allocation4 + $0x98] sm:$0xff] %v2299_v52 }
 0x1ae   : > { %1267 = vst [vmem:[#allocation4 + $0xa0] sm:$0xff] %v2299_v52 }
 0x1af   : > { %1268 = vst [vmem:[#allocation4 + $0xa8] sm:$0xff] %v2299_v52 }
 0x1b0   : > { %1269 = vst [vmem:[#allocation4 + $0xb0] sm:$0xff] %v2299_v52 }
 0x1b1   : > { %1270 = vst [vmem:[#allocation4 + $0xb8] sm:$0xff] %v2299_v52 }
 0x1b2   : > { %1271 = vst [vmem:[#allocation4 + $0xc0] sm:$0xff] %v2299_v52 }
 0x1b3   : > { %1272 = vst [vmem:[#allocation4 + $0xc8] sm:$0xff] %v2299_v52 }
 0x1b4   : > { %1273 = vst [vmem:[#allocation4 + $0xd0] sm:$0xff] %v2299_v52 }
 0x1b5   : > { %1274 = vst [vmem:[#allocation4 + $0xd8] sm:$0xff] %v2299_v52 }
 0x1b6   : > { %1275 = vst [vmem:[#allocation4 + $0xe0] sm:$0xff] %v2299_v52 }
 0x1b7   : > { %1276 = vst [vmem:[#allocation4 + $0xe8] sm:$0xff] %v2299_v52 }
 0x1b8   : > { %1277 = vst [vmem:[#allocation4 + $0xf0] sm:$0xff] %v2299_v52 }
 0x1b9   : > { %1278 = vst [vmem:[#allocation4 + $0xf8] sm:$0xff] %v2299_v52 }
 0x1ba PF: > { %v2107_v53 = vld [vmem:[%s2536_s8 + $0xe0] sm:$0xf]  ;;  %v2204_v54 = vld [vmem:[%s2536_s8 + $0xec] sm:$0xf0]  ;;  %v2202_v55 = vld [vmem:[%s2536_s8 + $0xe4] sm:$0xf] }
 0x1bb   : > { %v2108_v56 = vor.u32 %v2204_v54, %v2107_v53  ;;  %v2109_v57 = vld [vmem:[%s2536_s8 + $0xf0] sm:$0xf0]  ;;  %v2115_v58 = vld [vmem:[%s2536_s8 + $0xe8] sm:$0xf]  ;;  %v2205_v59 = vld [vmem:[%s2536_s8 + $0xf4] sm:$0xf0] }
 0x1bc   : > { %v2112_v60 = vor.u32 %v2202_v55, %v2109_v57  ;;  %v2116_v61 = vor.u32 %v2205_v59, %v2115_v58  ;;  %v2203_v62 = vld [vmem:[%s2536_s8 + $0xec] sm:$0xf]  ;;  %v2117_v63 = vld [vmem:[%s2536_s8 + $0xf8] sm:$0xf0]  ;;  %v2091_v0 = vld [vmem:[%s2536_s8 + $0xc0] sm:$0xf] }
 0x1bd   : > { %1503 = vmatpush.bf16.msrb.mxu0 %v2108_v56  ;;  %v2120_v1 = vor.u32 %v2203_v62, %v2117_v63  ;;  %v2200_v2 = vld [vmem:[%s2536_s8 + $0xcc] sm:$0xf0]  ;;  %v2198_v3 = vld [vmem:[%s2536_s8 + $0xc4] sm:$0xf]  ;;  %v2093_v4 = vld [vmem:[%s2536_s8 + $0xd0] sm:$0xf0] }
 0x1be   : > { %1532 = vmatpush.bf16.msrb.mxu1 %v2112_v60  ;;  %1561 = vmatpush.bf16.msrb.mxu2 %v2116_v61  ;;  %v2092_v5 = vor.u32 %v2200_v2, %v2091_v0  ;;  %v2096_v6 = vor.u32 %v2198_v3, %v2093_v4  ;;  %v2099_v7 = vld [vmem:[%s2536_s8 + $0xc8] sm:$0xf]  ;;  %v2201_v8 = vld [vmem:[%s2536_s8 + $0xd4] sm:$0xf0]  ;;  %v2199_v9 = vld [vmem:[%s2536_s8 + $0xcc] sm:$0xf] }
 0x1bf   : > { %1590 = vmatpush.bf16.msrb.mxu3 %v2120_v1  ;;  %v2100_v10 = vor.u32 %v2201_v8, %v2099_v7  ;;  %v2101_v11 = vld [vmem:[%s2536_s8 + $0xd8] sm:$0xf0]  ;;  %v2075_v12 = vld [vmem:[%s2536_s8 + $0xa0] sm:$0xf]  ;;  %v2196_v13 = vld [vmem:[%s2536_s8 + $0xac] sm:$0xf0] }
 0x1c0   : > { %v2104_v14 = vor.u32 %v2199_v9, %v2101_v11  ;;  %v2194_v15 = vld [vmem:[%s2536_s8 + $0xa4] sm:$0xf]  ;;  %v2077_v16 = vld [vmem:[%s2536_s8 + $0xb0] sm:$0xf0]  ;;  %v2083_v17 = vld [vmem:[%s2536_s8 + $0xa8] sm:$0xf]  ;;  %v2076_v18 = vor.u32 %v2196_v13, %v2075_v12 }
 0x1c1   : > { %1504 = vmatpush.bf16.msrb.mxu0 %v2092_v5  ;;  %v2197_v19 = vld [vmem:[%s2536_s8 + $0xb4] sm:$0xf0]  ;;  %v2195_v20 = vld [vmem:[%s2536_s8 + $0xac] sm:$0xf]  ;;  %v2085_v21 = vld [vmem:[%s2536_s8 + $0xb8] sm:$0xf0]  ;;  %v2080_v22 = vor.u32 %v2194_v15, %v2077_v16 }
 0x1c2   : > { %1533 = vmatpush.bf16.msrb.mxu1 %v2096_v6  ;;  %1562 = vmatpush.bf16.msrb.mxu2 %v2100_v10  ;;  %v2084_v23 = vor.u32 %v2197_v19, %v2083_v17  ;;  %v2059_v24 = vld [vmem:[%s2536_s8 + $0x80] sm:$0xf]  ;;  %v2192_v25 = vld [vmem:[%s2536_s8 + $0x8c] sm:$0xf0]  ;;  %v2190_v26 = vld [vmem:[%s2536_s8 + $0x84] sm:$0xf]  ;;  %v2088_v27 = vor.u32 %v2195_v20, %v2085_v21 }
 0x1c3   : > { %1591 = vmatpush.bf16.msrb.mxu3 %v2104_v14  ;;  %v2061_v28 = vld [vmem:[%s2536_s8 + $0x90] sm:$0xf0]  ;;  %v2067_v29 = vld [vmem:[%s2536_s8 + $0x88] sm:$0xf]  ;;  %v2193_v30 = vld [vmem:[%s2536_s8 + $0x94] sm:$0xf0]  ;;  %v2060_v33 = vor.u32 %v2192_v25, %v2059_v24 }
 0x1c4   : > { %v2191_v31 = vld [vmem:[%s2536_s8 + $0x8c] sm:$0xf]  ;;  %v2069_v32 = vld [vmem:[%s2536_s8 + $0x98] sm:$0xf0]  ;;  %v2064_v34 = vor.u32 %v2190_v26, %v2061_v28  ;;  %v2068_v35 = vor.u32 %v2193_v30, %v2067_v29  ;;  %v2043_v36 = vld [vmem:[%s2536_s8 + $0x60] sm:$0xf] }
 0x1c5   : > { %1505 = vmatpush.bf16.msrb.mxu0 %v2076_v18  ;;  %v2188_v37 = vld [vmem:[%s2536_s8 + $0x6c] sm:$0xf0]  ;;  %v2186_v38 = vld [vmem:[%s2536_s8 + $0x64] sm:$0xf]  ;;  %v2072_v39 = vor.u32 %v2191_v31, %v2069_v32  ;;  %v2045_v40 = vld [vmem:[%s2536_s8 + $0x70] sm:$0xf0] }
 0x1c6   : > { %1534 = vmatpush.bf16.msrb.mxu1 %v2080_v22  ;;  %1563 = vmatpush.bf16.msrb.mxu2 %v2084_v23  ;;  %v2051_v41 = vld [vmem:[%s2536_s8 + $0x68] sm:$0xf]  ;;  %v2189_v42 = vld [vmem:[%s2536_s8 + $0x74] sm:$0xf0]  ;;  %v2187_v43 = vld [vmem:[%s2536_s8 + $0x6c] sm:$0xf]  ;;  %v2044_v45 = vor.u32 %v2188_v37, %v2043_v36  ;;  %v2048_v46 = vor.u32 %v2186_v38, %v2045_v40 }
 0x1c7   : > { %1592 = vmatpush.bf16.msrb.mxu3 %v2088_v27  ;;  %v2053_v44 = vld [vmem:[%s2536_s8 + $0x78] sm:$0xf0]  ;;  %v2052_v47 = vor.u32 %v2189_v42, %v2051_v41  ;;  %v2027_v52 = vld [vmem:[%s2536_s8 + $0x40] sm:$0xf]  ;;  %v2184_v53 = vld [vmem:[%s2536_s8 + $0x4c] sm:$0xf0] }
 0x1c8   : > { %v2182_v54 = vld [vmem:[%s2536_s8 + $0x44] sm:$0xf]  ;;  %v2056_v55 = vor.u32 %v2187_v43, %v2053_v44  ;;  %v2029_v56 = vld [vmem:[%s2536_s8 + $0x50] sm:$0xf0]  ;;  %v2035_v57 = vld [vmem:[%s2536_s8 + $0x48] sm:$0xf]  ;;  %v2028_v61 = vor.u32 %v2184_v53, %v2027_v52 }
 0x1c9   : > { %1506 = vmatpush.bf16.msrb.mxu0 %v2060_v33  ;;  %v2185_v58 = vld [vmem:[%s2536_s8 + $0x54] sm:$0xf0]  ;;  %v2183_v59 = vld [vmem:[%s2536_s8 + $0x4c] sm:$0xf]  ;;  %v2037_v60 = vld [vmem:[%s2536_s8 + $0x58] sm:$0xf0]  ;;  %v2032_v63 = vor.u32 %v2182_v54, %v2029_v56 }
 0x1ca   : > { %1535 = vmatpush.bf16.msrb.mxu1 %v2064_v34  ;;  %1564 = vmatpush.bf16.msrb.mxu2 %v2068_v35  ;;  %v2011_v62 = vld [vmem:[%s2536_s8 + $0x20] sm:$0xf]  ;;  %v2036_v0 = vor.u32 %v2185_v58, %v2035_v57  ;;  %v2180_v1 = vld [vmem:[%s2536_s8 + $0x2c] sm:$0xf0]  ;;  %v2178_v2 = vld [vmem:[%s2536_s8 + $0x24] sm:$0xf]  ;;  %v2040_v4 = vor.u32 %v2183_v59, %v2037_v60 }
 0x1cb   : > { %1593 = vmatpush.bf16.msrb.mxu3 %v2072_v39  ;;  %v2013_v3 = vld [vmem:[%s2536_s8 + $0x30] sm:$0xf0]  ;;  %v2019_v5 = vld [vmem:[%s2536_s8 + $0x28] sm:$0xf]  ;;  %v2181_v6 = vld [vmem:[%s2536_s8 + $0x34] sm:$0xf0]  ;;  %v2012_v9 = vor.u32 %v2180_v1, %v2011_v62 }
 0x1cc   : > { %v2179_v7 = vld [vmem:[%s2536_s8 + $0x2c] sm:$0xf]  ;;  %v2021_v8 = vld [vmem:[%s2536_s8 + $0x38] sm:$0xf0]  ;;  %v2016_v10 = vor.u32 %v2178_v2, %v2013_v3  ;;  %v2020_v11 = vor.u32 %v2181_v6, %v2019_v5  ;;  %v1995_v12 = vld [vmem:[%s2536_s8] sm:$0xf] }
 0x1cd   : > { %1507 = vmatpush.bf16.msrb.mxu0 %v2044_v45  ;;  %v2176_v13 = vld [vmem:[%s2536_s8 + $0xc] sm:$0xf0]  ;;  %v2174_v14 = vld [vmem:[%s2536_s8 + $0x4] sm:$0xf]  ;;  %v2024_v15 = vor.u32 %v2179_v7, %v2021_v8  ;;  %v1997_v16 = vld [vmem:[%s2536_s8 + $0x10] sm:$0xf0] }
 0x1ce   : > { %1536 = vmatpush.bf16.msrb.mxu1 %v2048_v46  ;;  %1565 = vmatpush.bf16.msrb.mxu2 %v2052_v47  ;;  %v2003_v17 = vld [vmem:[%s2536_s8 + $0x8] sm:$0xf]  ;;  %v2177_v18 = vld [vmem:[%s2536_s8 + $0x14] sm:$0xf0]  ;;  %v2175_v19 = vld [vmem:[%s2536_s8 + $0xc] sm:$0xf]  ;;  %v1996_v21 = vor.u32 %v2176_v13, %v1995_v12  ;;  %v2000_v22 = vor.u32 %v2174_v14, %v1997_v16 }
 0x1cf   : > { %1594 = vmatpush.bf16.msrb.mxu3 %v2056_v55  ;;  %v2005_v20 = vld [vmem:[%s2536_s8 + $0x18] sm:$0xf0]  ;;  %v2004_v23 = vor.u32 %v2177_v18, %v2003_v17  ;;  %v1280_v25 = vld [vmem:[#allocation4 + $0x8] sm:$0xff]  ;;  %v1281_v29 = vld [vmem:[#allocation4 + $0x10] sm:$0xff]  ;;  %s2300_s21 = smov [#allocation4]   ;;  %s1690_s17 = sshll.u32 %s2788_s6, 4  ;;  %s1691_s17 = int_to_ptr.hbm [resolvable:$true] %s1690_s17 }
 0x1d0   : > { %v2008_v24 = vor.u32 %v2175_v19, %v2005_v20  ;;  %v1282_v30 = vld [vmem:[#allocation4 + $0x18] sm:$0xff]  ;;  %v1283_v31 = vld [vmem:[#allocation4 + $0x20] sm:$0xff]  ;;  %v1284_v32 = vld [vmem:[#allocation4 + $0x28] sm:$0xff]  ;;  %s1688_s20 = sshll.u32 %s2300_s21, 4  ;;  %p2210_p11 = scmp.eq.s32.totalorder %s2354_s24, 3  ;;  %s1689_s20 = int_to_ptr.vmem [resolvable:$true] %s1688_s20 }
 0x1d1   : > { %1508 = vmatpush.bf16.msrb.mxu0 %v2028_v61  ;;  %v1285_v39 = vld [vmem:[#allocation4 + $0x30] sm:$0xff]  ;;  %v1286_v40 = vld [vmem:[#allocation4 + $0x38] sm:$0xff]  ;;  %v1287_v41 = vld [vmem:[#allocation4 + $0x40] sm:$0xff]  ;;  %s2301_s18 = smov 512   ;;  %s2302_s19 = smov 32  }
 0x1d2   : > { %1537 = vmatpush.bf16.msrb.mxu1 %v2032_v63  ;;  %1566 = vmatpush.bf16.msrb.mxu2 %v2036_v0  ;;  %v1288_v43 = vld [vmem:[#allocation4 + $0x48] sm:$0xff]  ;;  %v1289_v55 = vld [vmem:[#allocation4 + $0x50] sm:$0xff]  ;;  %v1290_v56 = vld [vmem:[#allocation4 + $0x58] sm:$0xff] }
 0x1d3   : > { %1595 = vmatpush.bf16.msrb.mxu3 %v2040_v4  ;;  %v1291_v57 = vld [vmem:[#allocation4 + $0x60] sm:$0xff]  ;;  %v1292_v59 = vld [vmem:[#allocation4 + $0x68] sm:$0xff]  ;;  %v1293_v3 = vld [vmem:[#allocation4 + $0x70] sm:$0xff] }
 0x1d4   : > { %v1294_v4 = vld [vmem:[#allocation4 + $0x78] sm:$0xff]  ;;  %v1295_v5 = vld [vmem:[#allocation4 + $0x80] sm:$0xff]  ;;  %v1296_v7 = vld [vmem:[#allocation4 + $0x88] sm:$0xff] }
 0x1d5   : > { %1509 = vmatpush.bf16.msrb.mxu0 %v2012_v9  ;;  %v1298_v16 = vld [vmem:[#allocation4 + $0x98] sm:$0xff]  ;;  %v1299_v17 = vld [vmem:[#allocation4 + $0xa0] sm:$0xff]  ;;  %v1300_v19 = vld [vmem:[#allocation4 + $0xa8] sm:$0xff] }
 0x1d6   : > { %1538 = vmatpush.bf16.msrb.mxu1 %v2016_v10  ;;  %1567 = vmatpush.bf16.msrb.mxu2 %v2020_v11 }
 0x1d7   : > { %1596 = vmatpush.bf16.msrb.mxu3 %v2024_v15  ;;  %v1297_v15 = vld [vmem:[#allocation4 + $0x90] sm:$0xff] }
 0x1d9   : > { %1510 = vmatpush.bf16.msrb.mxu0 %v1996_v21 }
 0x1da   : > { %1539 = vmatpush.bf16.msrb.mxu1 %v2000_v22  ;;  %1568 = vmatpush.bf16.msrb.mxu2 %v2004_v23 }
 0x1db   : > { %1597 = vmatpush.bf16.msrb.mxu3 %v2008_v24 }
 0x1dc   : > { %1511 = vmatmul.bf16.vlgmr.msrb.gmra.mxu0 %v2679_v48 }
 0x1dd   : > { %1540 = vmatmul.bf16.vlgmr.msrb.gmra.mxu1 %v2679_v48  ;;  %1569 = vmatmul.bf16.vlgmr.msrb.gmra.mxu2 %v2679_v48 }
 0x1de   : > { %1598 = vmatmul.bf16.vlgmr.msrb.gmra.mxu3 %v2679_v48  ;;  %v1279_v48 = vld [vmem:[#allocation4] sm:$0xff] }
 0x1ec   : > { %1516 = vmatmul.bf16.gmra.mxu0 %v2681_v49 }
 0x1ed   : > { %1545 = vmatmul.bf16.gmra.mxu1 %v2681_v49  ;;  %1574 = vmatmul.bf16.gmra.mxu2 %v2681_v49 }
 0x1ee   : > { %1603 = vmatmul.bf16.gmra.mxu3 %v2681_v49 }
 0x1fc   : > { %1521 = vmatmul.bf16.gmra.mxu0 %v2683_v50 }
 0x1fd   : > { %1550 = vmatmul.bf16.gmra.mxu1 %v2683_v50  ;;  %1579 = vmatmul.bf16.gmra.mxu2 %v2683_v50 }
 0x1fe   : > { %1608 = vmatmul.bf16.gmra.mxu3 %v2683_v50 }
 0x20c   : > { %1526 = vmatmul.bf16.gmra.mxu0 %v2685_v51 }
 0x20d   : > { %1555 = vmatmul.bf16.gmra.mxu1 %v2685_v51  ;;  %1584 = vmatmul.bf16.gmra.mxu2 %v2685_v51 }
 0x20e   : > { %1613 = vmatmul.bf16.gmra.mxu3 %v2685_v51 }
 0x259   : > { %v1512_v26 = vpop.f32.mrf.mxu0 }
 0x25a   : > { %v1619_v49 = vadd.f32 %v1512_v26, %v1279_v48  ;;  %v1541_v27 = vpop.f32.mrf.mxu1  ;;  %v1301_v26 = vld [vmem:[#allocation4 + $0xb0] sm:$0xff] }
 0x25b   : > { %v1620_v28 = vadd.f32 %v1541_v27, %v1280_v25  ;;  %v1303_v27 = vld [vmem:[#allocation4 + $0xc0] sm:$0xff] }
 0x25c   : > { %1651 = vst [vmem:[#allocation4] sm:$0xff] %v1619_v49  ;;  %v1302_v49 = vld [vmem:[#allocation4 + $0xb8] sm:$0xff] }
 0x25d   : > { %1652 = vst [vmem:[#allocation4 + $0x8] sm:$0xff] %v1620_v28 }
 0x260   : > { %v1570_v50 = vpop.f32.mrf.mxu2 }
 0x261   : > { %v1621_v33 = vadd.f32 %v1570_v50, %v1281_v29  ;;  %v1599_v34 = vpop.f32.mrf.mxu3  ;;  %v1514_v35 = vpop.f32.mrf.mxu0  ;;  %v1304_v29 = vld [vmem:[#allocation4 + $0xc8] sm:$0xff] }
 0x262   : > { %v1622_v36 = vadd.f32 %v1599_v34, %v1282_v30  ;;  %v1623_v37 = vadd.f32 %v1514_v35, %v1283_v31  ;;  %v1543_v38 = vpop.f32.mrf.mxu1 }
 0x263   : > { %1653 = vst [vmem:[#allocation4 + $0x10] sm:$0xff] %v1621_v33  ;;  %v1624_v51 = vadd.f32 %v1543_v38, %v1284_v32  ;;  %v1307_v38 = vld [vmem:[#allocation4 + $0xe0] sm:$0xff] }
 0x264   : > { %1654 = vst [vmem:[#allocation4 + $0x18] sm:$0xff] %v1622_v36  ;;  %v1305_v36 = vld [vmem:[#allocation4 + $0xd0] sm:$0xff] }
 0x265   : > { %1655 = vst [vmem:[#allocation4 + $0x20] sm:$0xff] %v1623_v37  ;;  %v1306_v37 = vld [vmem:[#allocation4 + $0xd8] sm:$0xff] }
 0x266   : > { %1656 = vst [vmem:[#allocation4 + $0x28] sm:$0xff] %v1624_v51 }
 0x268   : > { %v1572_v42 = vpop.f32.mrf.mxu2 }
 0x269   : > { %v1625_v44 = vadd.f32 %v1572_v42, %v1285_v39  ;;  %v1601_v45 = vpop.f32.mrf.mxu3  ;;  %v1517_v46 = vpop.f32.mrf.mxu0  ;;  %v1308_v39 = vld [vmem:[#allocation4 + $0xe8] sm:$0xff] }
 0x26a   : > { %v1626_v47 = vadd.f32 %v1601_v45, %v1286_v40  ;;  %v1627_v52 = vadd.f32 %v1517_v46, %v1287_v41  ;;  %v1546_v53 = vpop.f32.mrf.mxu1 }
 0x26b   : > { %1657 = vst [vmem:[#allocation4 + $0x30] sm:$0xff] %v1625_v44  ;;  %v1628_v54 = vadd.f32 %v1546_v53, %v1288_v43 }
 0x26c   : > { %1658 = vst [vmem:[#allocation4 + $0x38] sm:$0xff] %v1626_v47  ;;  %v1309_v47 = vld [vmem:[#allocation4 + $0xf0] sm:$0xff] }
 0x26d   : > { %1659 = vst [vmem:[#allocation4 + $0x40] sm:$0xff] %v1627_v52  ;;  %v1310_v52 = vld [vmem:[#allocation4 + $0xf8] sm:$0xff] }
 0x26e   : > { %1660 = vst [vmem:[#allocation4 + $0x48] sm:$0xff] %v1628_v54 }
 0x270   : > { %v1575_v58 = vpop.f32.mrf.mxu2 }
 0x271   : > { %v1629_v60 = vadd.f32 %v1575_v58, %v1289_v55  ;;  %v1604_v61 = vpop.f32.mrf.mxu3  ;;  %v1519_v62 = vpop.f32.mrf.mxu0 }
 0x272   : > { %v1630_v63 = vadd.f32 %v1604_v61, %v1290_v56  ;;  %v1631_v0 = vadd.f32 %v1519_v62, %v1291_v57  ;;  %v1548_v1 = vpop.f32.mrf.mxu1 }
 0x273   : > { %1661 = vst [vmem:[#allocation4 + $0x50] sm:$0xff] %v1629_v60  ;;  %v1632_v2 = vadd.f32 %v1548_v1, %v1292_v59 }
 0x274   : > { %1662 = vst [vmem:[#allocation4 + $0x58] sm:$0xff] %v1630_v63 }
 0x275   : > { %1663 = vst [vmem:[#allocation4 + $0x60] sm:$0xff] %v1631_v0 }
 0x276   : > { %1664 = vst [vmem:[#allocation4 + $0x68] sm:$0xff] %v1632_v2 }
 0x278   : > { %v1577_v6 = vpop.f32.mrf.mxu2 }
 0x279   : > { %v1633_v8 = vadd.f32 %v1577_v6, %v1293_v3  ;;  %v1606_v9 = vpop.f32.mrf.mxu3  ;;  %v1522_v10 = vpop.f32.mrf.mxu0 }
 0x27a   : > { %v1634_v11 = vadd.f32 %v1606_v9, %v1294_v4  ;;  %v1635_v12 = vadd.f32 %v1522_v10, %v1295_v5  ;;  %v1551_v13 = vpop.f32.mrf.mxu1 }
 0x27b   : > { %1665 = vst [vmem:[#allocation4 + $0x70] sm:$0xff] %v1633_v8  ;;  %v1636_v14 = vadd.f32 %v1551_v13, %v1296_v7 }
 0x27c   : > { %1666 = vst [vmem:[#allocation4 + $0x78] sm:$0xff] %v1634_v11 }
 0x27d   : > { %1667 = vst [vmem:[#allocation4 + $0x80] sm:$0xff] %v1635_v12 }
 0x27e   : > { %1668 = vst [vmem:[#allocation4 + $0x88] sm:$0xff] %v1636_v14 }
 0x280   : > { %v1580_v18 = vpop.f32.mrf.mxu2 }
 0x281   : > { %v1637_v20 = vadd.f32 %v1580_v18, %v1297_v15  ;;  %v1609_v21 = vpop.f32.mrf.mxu3  ;;  %v1524_v22 = vpop.f32.mrf.mxu0 }
 0x282   : > { %v1638_v23 = vadd.f32 %v1609_v21, %v1298_v16  ;;  %v1639_v24 = vadd.f32 %v1524_v22, %v1299_v17  ;;  %v1553_v48 = vpop.f32.mrf.mxu1 }
 0x283   : > { %1669 = vst [vmem:[#allocation4 + $0x90] sm:$0xff] %v1637_v20  ;;  %v1640_v25 = vadd.f32 %v1553_v48, %v1300_v19 }
 0x284   : > { %1670 = vst [vmem:[#allocation4 + $0x98] sm:$0xff] %v1638_v23 }
 0x285   : > { %1671 = vst [vmem:[#allocation4 + $0xa0] sm:$0xff] %v1639_v24 }
 0x286   : > { %1672 = vst [vmem:[#allocation4 + $0xa8] sm:$0xff] %v1640_v25 }
 0x288   : > { %v1582_v28 = vpop.f32.mrf.mxu2 }
 0x289   : > { %v1641_v30 = vadd.f32 %v1582_v28, %v1301_v26  ;;  %v1611_v31 = vpop.f32.mrf.mxu3  ;;  %v1527_v50 = vpop.f32.mrf.mxu0 }
 0x28a   : > { %v1642_v32 = vadd.f32 %v1611_v31, %v1302_v49  ;;  %v1643_v33 = vadd.f32 %v1527_v50, %v1303_v27  ;;  %v1556_v34 = vpop.f32.mrf.mxu1 }
 0x28b   : > { %1673 = vst [vmem:[#allocation4 + $0xb0] sm:$0xff] %v1641_v30  ;;  %v1644_v35 = vadd.f32 %v1556_v34, %v1304_v29 }
 0x28c   : > { %1674 = vst [vmem:[#allocation4 + $0xb8] sm:$0xff] %v1642_v32 }
 0x28d   : > { %1675 = vst [vmem:[#allocation4 + $0xc0] sm:$0xff] %v1643_v33 }
 0x28e   : > { %1676 = vst [vmem:[#allocation4 + $0xc8] sm:$0xff] %v1644_v35 }
 0x290   : > { %v1585_v51 = vpop.f32.mrf.mxu2 }
 0x291   : > { %v1645_v40 = vadd.f32 %v1585_v51, %v1305_v36  ;;  %v1614_v41 = vpop.f32.mrf.mxu3  ;;  %v1529_v42 = vpop.f32.mrf.mxu0 }
 0x292   : > { %v1646_v43 = vadd.f32 %v1614_v41, %v1306_v37  ;;  %v1647_v44 = vadd.f32 %v1529_v42, %v1307_v38  ;;  %v1558_v45 = vpop.f32.mrf.mxu1 }
 0x293   : > { %1677 = vst [vmem:[#allocation4 + $0xd0] sm:$0xff] %v1645_v40  ;;  %v1648_v46 = vadd.f32 %v1558_v45, %v1308_v39 }
 0x294   : > { %1678 = vst [vmem:[#allocation4 + $0xd8] sm:$0xff] %v1646_v43 }
 0x295   : > { %1679 = vst [vmem:[#allocation4 + $0xe0] sm:$0xff] %v1647_v44 }
 0x296   : > { %1680 = vst [vmem:[#allocation4 + $0xe8] sm:$0xff] %v1648_v46 }
 0x298   : > { %v1587_v53 = vpop.f32.mrf.mxu2 }
 0x299   : > { %v1649_v54 = vadd.f32 %v1587_v53, %v1309_v47  ;;  %v1616_v55 = vpop.f32.mrf.mxu3 }
 0x29a   : > { %v1650_v56 = vadd.f32 %v1616_v55, %v1310_v52 }
 0x29b   : > { %1681 = vst [vmem:[#allocation4 + $0xf0] sm:$0xff] %v1649_v54 }
 0x29c   : > { %1682 = vst [vmem:[#allocation4 + $0xf8] sm:$0xff] %v1650_v56 }
 0x29d   : > { %2207 = dma.vmem_to_hbm [thread:$0]  (%p2210_p11), %s1689_s20, 4096, %s1691_s17, [#allocation5], %s2301_s18, %s2301_s18, %s2302_s19  }
 0x29e   : > { %2284 = dma.done.wait (%p2210_p11), [#allocation5], 4096  }
 0x29f   : > { %2286 = vsyncadd (%p2210_p11), [#allocation5], 4294963200 }
 0x2a0 PF: > { %p14_p12 = scmp.ge.s32.totalorder %s2357_s25, 6   ;;  %s2790_s21 = smov %s2293_s22 }
 0x2a1   : > { %s2791_s22 = smov %s2366_s28  ;;  %s2792_s23 = smov %s2357_s25 }
 0x2a2   :  { %16 = sbr.rel (!%p14_p12) target bundleno = 2 (0x2), region = 176 }
 0x2a7   :  { %1707 = vsyncpa [#allocation5], 1 }
 0x2a8   :  { %1709 = vsyncpa [#allocation5 + $0x1], 1 }

</bundles_post_ra>
